<compile_context>
chip_gen: v5e
topology: v5e:2x2
jax: 0.10.0
libtpu: 0.0.40
codegen_flags: <defaults>
</compile_context>

<pallas_src>
import functools

import jax
import jax.numpy as jnp
import numpy as np
from jax.experimental import pallas as pl
from jax.experimental.pallas import tpu as pltpu


def _layer_norm(x, gamma, beta, eps=1e-5):
    mu = jnp.mean(x, axis=-1, keepdims=True)
    xc = x - mu
    var = jnp.mean(xc * xc, axis=-1, keepdims=True)
    return xc * jax.lax.rsqrt(var + eps) * gamma + beta


def _encoder_stack_kernel(src_ref, pos_ref,
                          wq_ref, wk_ref, wv_ref,
                          bq_ref, bk_ref, bv_ref,
                          wo_ref, bo_ref,
                          w1_ref, b1_ref, w2_ref, b2_ref,
                          g1_ref, be1_ref, g2_ref, be2_ref,
                          *rest, nlayers, nhead, head_dim, final_norm):
    # Per-batch-element block: src/pos/out are (S, D); all weights are stacked (L, ...)
    # and fully VMEM-resident for the whole kernel.
    if final_norm:
        gf_ref, bf_ref, o_ref = rest
    else:
        (o_ref,) = rest

    x = src_ref[...].astype(jnp.float32)               # (S, D)
    p = pos_ref[...].astype(jnp.float32)                # (S, D)
    s_len, d_model = x.shape

    for l in range(nlayers):                            # static unroll over layers
        qk_in = x + p                                    # q = k = src + pos

        # Projections (1/sqrt(head_dim) already folded into wq/bq in the wrapper).
        q = jnp.dot(qk_in, wq_ref[l], preferred_element_type=jnp.float32) + bq_ref[l]
        k = jnp.dot(qk_in, wk_ref[l], preferred_element_type=jnp.float32) + bk_ref[l]
        v = jnp.dot(x, wv_ref[l], preferred_element_type=jnp.float32) + bv_ref[l]

        # Multi-head attention: static per-head loop, per-head out-proj accumulate.
        wo = wo_ref[l]
        attn_out = jnp.zeros((s_len, d_model), jnp.float32)
        for h in range(nhead):
            lo = h * head_dim
            hi = lo + head_dim
            qh = q[:, lo:hi]
            kh = k[:, lo:hi]
            vh = v[:, lo:hi]
            # scores = qh @ kh^T  (contract last dims -> MXU, no explicit transpose)
            scores = jax.lax.dot_general(qh, kh, (((1,), (1,)), ((), ())),
                                         preferred_element_type=jnp.float32)  # (S, S)
            scores = scores - jnp.max(scores, axis=-1, keepdims=True)
            pexp = jnp.exp(scores)
            attn = pexp / jnp.sum(pexp, axis=-1, keepdims=True)
            oh = jnp.dot(attn, vh, preferred_element_type=jnp.float32)         # (S, Dh)
            attn_out = attn_out + jnp.dot(oh, wo[lo:hi, :],
                                          preferred_element_type=jnp.float32)  # (S, D)
        attn_out = attn_out + bo_ref[l]

        # Residual + LayerNorm1
        x = _layer_norm(x + attn_out, g1_ref[l], be1_ref[l])

        # FFN (Linear -> ReLU -> Linear), residual + LayerNorm2
        h1 = jnp.dot(x, w1_ref[l], preferred_element_type=jnp.float32) + b1_ref[l]
        h1 = jnp.maximum(h1, 0.0)
        ff = jnp.dot(h1, w2_ref[l], preferred_element_type=jnp.float32) + b2_ref[l]
        x = _layer_norm(x + ff, g2_ref[l], be2_ref[l])

    if final_norm:
        x = _layer_norm(x, gf_ref[...], bf_ref[...])

    o_ref[...] = x.astype(o_ref.dtype)


def transformer_encoder_forward(src, pos, layer_params, nhead, norm_params=None):
    """TransformerEncoder.forward: stack of post-norm encoder layers + optional final norm.

    src, pos: (B, S, D) batch-first (layout plumbing vs PyTorch's (S, B, D)).
    """
    # TODO(synk): src_mask / src_key_padding_mask not implemented (None path only).
    # TODO(synk): dropout layers are identity (eval mode).
    B, S, D = src.shape
    L = len(layer_params)
    Fdim = layer_params[0]["linear1_weight"].shape[0]
    head_dim = D // nhead
    scale = 1.0 / float(np.sqrt(head_dim))

    wq_l, wk_l, wv_l, bq_l, bk_l, bv_l = [], [], [], [], [], []
    for lp in layer_params:
        wq, wk, wv = jnp.split(lp["in_proj_weight"], 3, axis=0)
        bq, bk, bv = jnp.split(lp["in_proj_bias"], 3, axis=0)
        wq_l.append(wq.T * scale)
        wk_l.append(wk.T)
        wv_l.append(wv.T)
        bq_l.append((bq * scale).reshape(1, D))
        bk_l.append(bk.reshape(1, D))
        bv_l.append(bv.reshape(1, D))

    args = [
        src, pos,
        jnp.stack(wq_l), jnp.stack(wk_l), jnp.stack(wv_l),                     # (L, D, D)
        jnp.stack(bq_l), jnp.stack(bk_l), jnp.stack(bv_l),                     # (L, 1, D)
        jnp.stack([lp["out_proj_weight"].T for lp in layer_params]),           # (L, D, D)
        jnp.stack([lp["out_proj_bias"].reshape(1, D) for lp in layer_params]), # (L, 1, D)
        jnp.stack([lp["linear1_weight"].T for lp in layer_params]),            # (L, D, F)
        jnp.stack([lp["linear1_bias"].reshape(1, Fdim) for lp in layer_params]),
        jnp.stack([lp["linear2_weight"].T for lp in layer_params]),            # (L, F, D)
        jnp.stack([lp["linear2_bias"].reshape(1, D) for lp in layer_params]),
        jnp.stack([lp["norm1_weight"].reshape(1, D) for lp in layer_params]),
        jnp.stack([lp["norm1_bias"].reshape(1, D) for lp in layer_params]),
        jnp.stack([lp["norm2_weight"].reshape(1, D) for lp in layer_params]),
        jnp.stack([lp["norm2_bias"].reshape(1, D) for lp in layer_params]),
    ]

    row_spec = pl.BlockSpec((None, S, D), lambda b: (b, 0, 0))

    def wspec(shape):
        return pl.BlockSpec(shape, lambda b, _n=len(shape): (0,) * _n)

    in_specs = [
        row_spec, row_spec,
        wspec((L, D, D)), wspec((L, D, D)), wspec((L, D, D)),
        wspec((L, 1, D)), wspec((L, 1, D)), wspec((L, 1, D)),
        wspec((L, D, D)), wspec((L, 1, D)),
        wspec((L, D, Fdim)), wspec((L, 1, Fdim)),
        wspec((L, Fdim, D)), wspec((L, 1, D)),
        wspec((L, 1, D)), wspec((L, 1, D)), wspec((L, 1, D)), wspec((L, 1, D)),
    ]

    final_norm = norm_params is not None
    if final_norm:
        args.append(norm_params["weight"].reshape(1, D))
        args.append(norm_params["bias"].reshape(1, D))
        in_specs.append(wspec((1, D)))
        in_specs.append(wspec((1, D)))

    kernel = functools.partial(_encoder_stack_kernel, nlayers=L, nhead=nhead,
                               head_dim=head_dim, final_norm=final_norm)
    return pl.pallas_call(
        kernel,
        out_shape=jax.ShapeDtypeStruct((B, S, D), jnp.float32),
        grid=(B,),
        in_specs=in_specs,
        out_specs=pl.BlockSpec((None, S, D), lambda b: (b, 0, 0)),
        compiler_params=pltpu.CompilerParams(dimension_semantics=("parallel",)),
    )(*args)


# ----------------------------- pure-JAX reference -----------------------------
def _ref_encoder(src, pos, layer_params, nhead, norm_params=None):
    x = src
    B, S, D = src.shape
    head_dim = D // nhead
    scale = 1.0 / float(np.sqrt(head_dim))
    for lp in layer_params:
        wq, wk, wv = jnp.split(lp["in_proj_weight"], 3, axis=0)
        bq, bk, bv = jnp.split(lp["in_proj_bias"], 3, axis=0)
        qk_in = x + pos
        q = (qk_in @ wq.T + bq) * scale
        k = qk_in @ wk.T + bk
        v = x @ wv.T + bv
        qh = q.reshape(B, S, nhead, head_dim).transpose(0, 2, 1, 3)
        kh = k.reshape(B, S, nhead, head_dim).transpose(0, 2, 1, 3)
        vh = v.reshape(B, S, nhead, head_dim).transpose(0, 2, 1, 3)
        scores = jnp.einsum("bhqd,bhkd->bhqk", qh, kh)
        attn = jax.nn.softmax(scores, axis=-1)
        ctx = jnp.einsum("bhqk,bhkd->bhqd", attn, vh)
        ctx = ctx.transpose(0, 2, 1, 3).reshape(B, S, D)
        attn_out = ctx @ lp["out_proj_weight"].T + lp["out_proj_bias"]
        x = _layer_norm(x + attn_out, lp["norm1_weight"], lp["norm1_bias"])
        ff = jnp.maximum(x @ lp["linear1_weight"].T + lp["linear1_bias"], 0.0)
        ff = ff @ lp["linear2_weight"].T + lp["linear2_bias"]
        x = _layer_norm(x + ff, lp["norm2_weight"], lp["norm2_bias"])
    if norm_params is not None:
        x = _layer_norm(x, norm_params["weight"], norm_params["bias"])
    return x


if __name__ == "__main__":
    # Small shapes implied by the module: batch=2, seq=8, d_model=32, nhead=4, ffn=64, layers=2.
    B, S, D, H, FF, L = 2, 8, 32, 4, 64, 2

    key = jax.random.PRNGKey(0)
    keys = iter(jax.random.split(key, 2 + 12 * L))

    def nrm(shape, s=0.1):
        return jax.random.normal(next(keys), shape, dtype=jnp.float32) * s

    src = jax.random.normal(next(keys), (B, S, D), dtype=jnp.float32)
    pos = jax.random.normal(next(keys), (B, S, D), dtype=jnp.float32) * 0.1

    layer_params = []
    for _ in range(L):
        layer_params.append(dict(
            in_proj_weight=nrm((3 * D, D)),
            in_proj_bias=nrm((3 * D,)),
            out_proj_weight=nrm((D, D)),
            out_proj_bias=nrm((D,)),
            linear1_weight=nrm((FF, D)),
            linear1_bias=nrm((FF,)),
            linear2_weight=nrm((D, FF)),
            linear2_bias=nrm((D,)),
            norm1_weight=1.0 + nrm((D,), 0.05),
            norm1_bias=nrm((D,), 0.05),
            norm2_weight=1.0 + nrm((D,), 0.05),
            norm2_bias=nrm((D,), 0.05),
        ))
    norm_params = dict(weight=jnp.ones((D,), jnp.float32),
                       bias=jnp.zeros((D,), jnp.float32))

    out = transformer_encoder_forward(src, pos, layer_params, H, norm_params)
    out = jax.block_until_ready(out)

    ref = _ref_encoder(src, pos, layer_params, H, norm_params)
    assert out.shape == (B, S, D)
    err = float(jnp.max(jnp.abs(out - ref)))
    assert jnp.allclose(out, ref, atol=2e-4, rtol=2e-4), f"mismatch vs reference (max abs err {err})"

    print("KERNEL_OK")
</pallas_src>

<mosaic_0001>
module attributes {stable_mosaic.version = 11 : i64} {
  func.func @_encoder_stack_kernel(%arg0: i32, %arg1: memref<1x8x32xf32, #tpu.memory_space<vmem>>, %arg2: memref<1x8x32xf32, #tpu.memory_space<vmem>>, %arg3: memref<2x32x32xf32, #tpu.memory_space<vmem>>, %arg4: memref<2x32x32xf32, #tpu.memory_space<vmem>>, %arg5: memref<2x32x32xf32, #tpu.memory_space<vmem>>, %arg6: memref<2x1x32xf32, #tpu.memory_space<vmem>>, %arg7: memref<2x1x32xf32, #tpu.memory_space<vmem>>, %arg8: memref<2x1x32xf32, #tpu.memory_space<vmem>>, %arg9: memref<2x32x32xf32, #tpu.memory_space<vmem>>, %arg10: memref<2x1x32xf32, #tpu.memory_space<vmem>>, %arg11: memref<2x32x64xf32, #tpu.memory_space<vmem>>, %arg12: memref<2x1x64xf32, #tpu.memory_space<vmem>>, %arg13: memref<2x64x32xf32, #tpu.memory_space<vmem>>, %arg14: memref<2x1x32xf32, #tpu.memory_space<vmem>>, %arg15: memref<2x1x32xf32, #tpu.memory_space<vmem>>, %arg16: memref<2x1x32xf32, #tpu.memory_space<vmem>>, %arg17: memref<2x1x32xf32, #tpu.memory_space<vmem>>, %arg18: memref<2x1x32xf32, #tpu.memory_space<vmem>>, %arg19: memref<1x32xf32, #tpu.memory_space<vmem>>, %arg20: memref<1x32xf32, #tpu.memory_space<vmem>>, %arg21: memref<1x8x32xf32, #tpu.memory_space<vmem>>) attributes {dimension_semantics = [#tpu.dimension_semantics<parallel>], iteration_bounds = array<i64: 2>, scalar_prefetch = 0 : i64, scratch_operands = 0 : i64, tpu.core_type = #tpu.core_type<tc>, window_params = [{transform_indices = @transform_0, window_bounds = array<i64: 1, 8, 32>}, {transform_indices = @transform_1, window_bounds = array<i64: 1, 8, 32>}, {pipeline_mode = #tpu.pipeline_mode<synchronous>, transform_indices = @transform_2, window_bounds = array<i64: 2, 32, 32>}, {pipeline_mode = #tpu.pipeline_mode<synchronous>, transform_indices = @transform_3, window_bounds = array<i64: 2, 32, 32>}, {pipeline_mode = #tpu.pipeline_mode<synchronous>, transform_indices = @transform_4, window_bounds = array<i64: 2, 32, 32>}, {pipeline_mode = #tpu.pipeline_mode<synchronous>, transform_indices = @transform_5, window_bounds = array<i64: 2, 1, 32>}, {pipeline_mode = #tpu.pipeline_mode<synchronous>, transform_indices = @transform_6, window_bounds = array<i64: 2, 1, 32>}, {pipeline_mode = #tpu.pipeline_mode<synchronous>, transform_indices = @transform_7, window_bounds = array<i64: 2, 1, 32>}, {pipeline_mode = #tpu.pipeline_mode<synchronous>, transform_indices = @transform_8, window_bounds = array<i64: 2, 32, 32>}, {pipeline_mode = #tpu.pipeline_mode<synchronous>, transform_indices = @transform_9, window_bounds = array<i64: 2, 1, 32>}, {pipeline_mode = #tpu.pipeline_mode<synchronous>, transform_indices = @transform_10, window_bounds = array<i64: 2, 32, 64>}, {pipeline_mode = #tpu.pipeline_mode<synchronous>, transform_indices = @transform_11, window_bounds = array<i64: 2, 1, 64>}, {pipeline_mode = #tpu.pipeline_mode<synchronous>, transform_indices = @transform_12, window_bounds = array<i64: 2, 64, 32>}, {pipeline_mode = #tpu.pipeline_mode<synchronous>, transform_indices = @transform_13, window_bounds = array<i64: 2, 1, 32>}, {pipeline_mode = #tpu.pipeline_mode<synchronous>, transform_indices = @transform_14, window_bounds = array<i64: 2, 1, 32>}, {pipeline_mode = #tpu.pipeline_mode<synchronous>, transform_indices = @transform_15, window_bounds = array<i64: 2, 1, 32>}, {pipeline_mode = #tpu.pipeline_mode<synchronous>, transform_indices = @transform_16, window_bounds = array<i64: 2, 1, 32>}, {pipeline_mode = #tpu.pipeline_mode<synchronous>, transform_indices = @transform_17, window_bounds = array<i64: 2, 1, 32>}, {pipeline_mode = #tpu.pipeline_mode<synchronous>, transform_indices = @transform_18, window_bounds = array<i64: 1, 32>}, {pipeline_mode = #tpu.pipeline_mode<synchronous>, transform_indices = @transform_19, window_bounds = array<i64: 1, 32>}, {transform_indices = @transform_20, window_bounds = array<i64: 1, 8, 32>}]} {
    %c0 = arith.constant 0 : index
    %c0_0 = arith.constant 0 : index
    %c0_1 = arith.constant 0 : index
    %0 = vector.load %arg1[%c0, %c0_0, %c0_1] : memref<1x8x32xf32, #tpu.memory_space<vmem>>, vector<1x8x32xf32>
    %1 = vector.shape_cast %0 : vector<1x8x32xf32> to vector<8x32xf32>
    %c0_2 = arith.constant 0 : index
    %c0_3 = arith.constant 0 : index
    %c0_4 = arith.constant 0 : index
    %2 = vector.load %arg2[%c0_2, %c0_3, %c0_4] : memref<1x8x32xf32, #tpu.memory_space<vmem>>, vector<1x8x32xf32>
    %3 = vector.shape_cast %2 : vector<1x8x32xf32> to vector<8x32xf32>
    %4 = arith.addf %1, %3 : vector<8x32xf32>
    %c0_5 = arith.constant 0 : index
    %c0_6 = arith.constant 0 : index
    %c0_7 = arith.constant 0 : index
    %5 = vector.load %arg3[%c0_5, %c0_6, %c0_7] : memref<2x32x32xf32, #tpu.memory_space<vmem>>, vector<1x32x32xf32>
    %6 = vector.shape_cast %5 : vector<1x32x32xf32> to vector<32x32xf32>
    %cst = arith.constant dense<0.000000e+00> : vector<8x32xf32>
    %7 = tpu.matmul %4, %6, %cst {dimension_numbers = #tpu.dot_dimension_numbers<[1], [0], [0], [1], [0, 0, 1, 1], [], []>} : vector<8x32xf32>, vector<32x32xf32>, vector<8x32xf32> -> vector<8x32xf32>
    %c0_8 = arith.constant 0 : index
    %c0_9 = arith.constant 0 : index
    %c0_10 = arith.constant 0 : index
    %8 = vector.load %arg6[%c0_8, %c0_9, %c0_10] : memref<2x1x32xf32, #tpu.memory_space<vmem>>, vector<1x1x32xf32>
    %9 = vector.shape_cast %8 : vector<1x1x32xf32> to vector<1x32xf32>
    %10 = vector.broadcast %9 : vector<1x32xf32> to vector<8x32xf32>
    %11 = arith.addf %7, %10 : vector<8x32xf32>
    %c0_11 = arith.constant 0 : index
    %c0_12 = arith.constant 0 : index
    %c0_13 = arith.constant 0 : index
    %12 = vector.load %arg4[%c0_11, %c0_12, %c0_13] : memref<2x32x32xf32, #tpu.memory_space<vmem>>, vector<1x32x32xf32>
    %13 = vector.shape_cast %12 : vector<1x32x32xf32> to vector<32x32xf32>
    %cst_14 = arith.constant dense<0.000000e+00> : vector<8x32xf32>
    %14 = tpu.matmul %4, %13, %cst_14 {dimension_numbers = #tpu.dot_dimension_numbers<[1], [0], [0], [1], [0, 0, 1, 1], [], []>} : vector<8x32xf32>, vector<32x32xf32>, vector<8x32xf32> -> vector<8x32xf32>
    %c0_15 = arith.constant 0 : index
    %c0_16 = arith.constant 0 : index
    %c0_17 = arith.constant 0 : index
    %15 = vector.load %arg7[%c0_15, %c0_16, %c0_17] : memref<2x1x32xf32, #tpu.memory_space<vmem>>, vector<1x1x32xf32>
    %16 = vector.shape_cast %15 : vector<1x1x32xf32> to vector<1x32xf32>
    %17 = vector.broadcast %16 : vector<1x32xf32> to vector<8x32xf32>
    %18 = arith.addf %14, %17 : vector<8x32xf32>
    %c0_18 = arith.constant 0 : index
    %c0_19 = arith.constant 0 : index
    %c0_20 = arith.constant 0 : index
    %19 = vector.load %arg5[%c0_18, %c0_19, %c0_20] : memref<2x32x32xf32, #tpu.memory_space<vmem>>, vector<1x32x32xf32>
    %20 = vector.shape_cast %19 : vector<1x32x32xf32> to vector<32x32xf32>
    %cst_21 = arith.constant dense<0.000000e+00> : vector<8x32xf32>
    %21 = tpu.matmul %1, %20, %cst_21 {dimension_numbers = #tpu.dot_dimension_numbers<[1], [0], [0], [1], [0, 0, 1, 1], [], []>} : vector<8x32xf32>, vector<32x32xf32>, vector<8x32xf32> -> vector<8x32xf32>
    %c0_22 = arith.constant 0 : index
    %c0_23 = arith.constant 0 : index
    %c0_24 = arith.constant 0 : index
    %22 = vector.load %arg8[%c0_22, %c0_23, %c0_24] : memref<2x1x32xf32, #tpu.memory_space<vmem>>, vector<1x1x32xf32>
    %23 = vector.shape_cast %22 : vector<1x1x32xf32> to vector<1x32xf32>
    %24 = vector.broadcast %23 : vector<1x32xf32> to vector<8x32xf32>
    %25 = arith.addf %21, %24 : vector<8x32xf32>
    %c0_25 = arith.constant 0 : index
    %c0_26 = arith.constant 0 : index
    %c0_27 = arith.constant 0 : index
    %26 = vector.load %arg9[%c0_25, %c0_26, %c0_27] : memref<2x32x32xf32, #tpu.memory_space<vmem>>, vector<1x32x32xf32>
    %27 = vector.shape_cast %26 : vector<1x32x32xf32> to vector<32x32xf32>
    %cst_28 = arith.constant 0.000000e+00 : f32
    %28 = vector.broadcast %cst_28 : f32 to vector<8x32xf32>
    %29 = vector.extract_strided_slice %11 {offsets = [0, 0], sizes = [8, 8], strides = [1, 1]} : vector<8x32xf32> to vector<8x8xf32>
    %30 = vector.extract_strided_slice %18 {offsets = [0, 0], sizes = [8, 8], strides = [1, 1]} : vector<8x32xf32> to vector<8x8xf32>
    %31 = vector.extract_strided_slice %25 {offsets = [0, 0], sizes = [8, 8], strides = [1, 1]} : vector<8x32xf32> to vector<8x8xf32>
    %cst_29 = arith.constant dense<0.000000e+00> : vector<8x8xf32>
    %32 = tpu.matmul %29, %30, %cst_29 {dimension_numbers = #tpu.dot_dimension_numbers<[1], [1], [0], [0], [0, 0, 1, 0], [], []>} : vector<8x8xf32>, vector<8x8xf32>, vector<8x8xf32> -> vector<8x8xf32>
    %cst_30 = arith.constant dense<0xFF800000> : vector<8xf32>
    %33 = vector.multi_reduction <maximumf>, %32, %cst_30 [1] : vector<8x8xf32> to vector<8xf32>
    %34 = vector.shape_cast %33 : vector<8xf32> to vector<8x1xf32>
    %35 = vector.broadcast %34 : vector<8x1xf32> to vector<8x8xf32>
    %36 = arith.subf %32, %35 : vector<8x8xf32>
    %37 = math.exp %36 : vector<8x8xf32>
    %cst_31 = arith.constant dense<0.000000e+00> : vector<8xf32>
    %38 = vector.multi_reduction <add>, %37, %cst_31 [1] : vector<8x8xf32> to vector<8xf32>
    %39 = vector.shape_cast %38 : vector<8xf32> to vector<8x1xf32>
    %40 = vector.broadcast %39 : vector<8x1xf32> to vector<8x8xf32>
    %41 = arith.divf %37, %40 : vector<8x8xf32>
    %cst_32 = arith.constant dense<0.000000e+00> : vector<8x8xf32>
    %42 = tpu.matmul %41, %31, %cst_32 {dimension_numbers = #tpu.dot_dimension_numbers<[1], [0], [0], [1], [0, 0, 1, 1], [], []>} : vector<8x8xf32>, vector<8x8xf32>, vector<8x8xf32> -> vector<8x8xf32>
    %43 = vector.extract_strided_slice %27 {offsets = [0, 0], sizes = [8, 32], strides = [1, 1]} : vector<32x32xf32> to vector<8x32xf32>
    %cst_33 = arith.constant dense<0.000000e+00> : vector<8x32xf32>
    %44 = tpu.matmul %42, %43, %cst_33 {dimension_numbers = #tpu.dot_dimension_numbers<[1], [0], [0], [1], [0, 0, 1, 1], [], []>} : vector<8x8xf32>, vector<8x32xf32>, vector<8x32xf32> -> vector<8x32xf32>
    %45 = arith.addf %28, %44 : vector<8x32xf32>
    %46 = vector.extract_strided_slice %11 {offsets = [0, 8], sizes = [8, 8], strides = [1, 1]} : vector<8x32xf32> to vector<8x8xf32>
    %47 = vector.extract_strided_slice %18 {offsets = [0, 8], sizes = [8, 8], strides = [1, 1]} : vector<8x32xf32> to vector<8x8xf32>
    %48 = vector.extract_strided_slice %25 {offsets = [0, 8], sizes = [8, 8], strides = [1, 1]} : vector<8x32xf32> to vector<8x8xf32>
    %cst_34 = arith.constant dense<0.000000e+00> : vector<8x8xf32>
    %49 = tpu.matmul %46, %47, %cst_34 {dimension_numbers = #tpu.dot_dimension_numbers<[1], [1], [0], [0], [0, 0, 1, 0], [], []>} : vector<8x8xf32>, vector<8x8xf32>, vector<8x8xf32> -> vector<8x8xf32>
    %cst_35 = arith.constant dense<0xFF800000> : vector<8xf32>
    %50 = vector.multi_reduction <maximumf>, %49, %cst_35 [1] : vector<8x8xf32> to vector<8xf32>
    %51 = vector.shape_cast %50 : vector<8xf32> to vector<8x1xf32>
    %52 = vector.broadcast %51 : vector<8x1xf32> to vector<8x8xf32>
    %53 = arith.subf %49, %52 : vector<8x8xf32>
    %54 = math.exp %53 : vector<8x8xf32>
    %cst_36 = arith.constant dense<0.000000e+00> : vector<8xf32>
    %55 = vector.multi_reduction <add>, %54, %cst_36 [1] : vector<8x8xf32> to vector<8xf32>
    %56 = vector.shape_cast %55 : vector<8xf32> to vector<8x1xf32>
    %57 = vector.broadcast %56 : vector<8x1xf32> to vector<8x8xf32>
    %58 = arith.divf %54, %57 : vector<8x8xf32>
    %cst_37 = arith.constant dense<0.000000e+00> : vector<8x8xf32>
    %59 = tpu.matmul %58, %48, %cst_37 {dimension_numbers = #tpu.dot_dimension_numbers<[1], [0], [0], [1], [0, 0, 1, 1], [], []>} : vector<8x8xf32>, vector<8x8xf32>, vector<8x8xf32> -> vector<8x8xf32>
    %60 = vector.extract_strided_slice %27 {offsets = [8, 0], sizes = [8, 32], strides = [1, 1]} : vector<32x32xf32> to vector<8x32xf32>
    %cst_38 = arith.constant dense<0.000000e+00> : vector<8x32xf32>
    %61 = tpu.matmul %59, %60, %cst_38 {dimension_numbers = #tpu.dot_dimension_numbers<[1], [0], [0], [1], [0, 0, 1, 1], [], []>} : vector<8x8xf32>, vector<8x32xf32>, vector<8x32xf32> -> vector<8x32xf32>
    %62 = arith.addf %45, %61 : vector<8x32xf32>
    %63 = vector.extract_strided_slice %11 {offsets = [0, 16], sizes = [8, 8], strides = [1, 1]} : vector<8x32xf32> to vector<8x8xf32>
    %64 = vector.extract_strided_slice %18 {offsets = [0, 16], sizes = [8, 8], strides = [1, 1]} : vector<8x32xf32> to vector<8x8xf32>
    %65 = vector.extract_strided_slice %25 {offsets = [0, 16], sizes = [8, 8], strides = [1, 1]} : vector<8x32xf32> to vector<8x8xf32>
    %cst_39 = arith.constant dense<0.000000e+00> : vector<8x8xf32>
    %66 = tpu.matmul %63, %64, %cst_39 {dimension_numbers = #tpu.dot_dimension_numbers<[1], [1], [0], [0], [0, 0, 1, 0], [], []>} : vector<8x8xf32>, vector<8x8xf32>, vector<8x8xf32> -> vector<8x8xf32>
    %cst_40 = arith.constant dense<0xFF800000> : vector<8xf32>
    %67 = vector.multi_reduction <maximumf>, %66, %cst_40 [1] : vector<8x8xf32> to vector<8xf32>
    %68 = vector.shape_cast %67 : vector<8xf32> to vector<8x1xf32>
    %69 = vector.broadcast %68 : vector<8x1xf32> to vector<8x8xf32>
    %70 = arith.subf %66, %69 : vector<8x8xf32>
    %71 = math.exp %70 : vector<8x8xf32>
    %cst_41 = arith.constant dense<0.000000e+00> : vector<8xf32>
    %72 = vector.multi_reduction <add>, %71, %cst_41 [1] : vector<8x8xf32> to vector<8xf32>
    %73 = vector.shape_cast %72 : vector<8xf32> to vector<8x1xf32>
    %74 = vector.broadcast %73 : vector<8x1xf32> to vector<8x8xf32>
    %75 = arith.divf %71, %74 : vector<8x8xf32>
    %cst_42 = arith.constant dense<0.000000e+00> : vector<8x8xf32>
    %76 = tpu.matmul %75, %65, %cst_42 {dimension_numbers = #tpu.dot_dimension_numbers<[1], [0], [0], [1], [0, 0, 1, 1], [], []>} : vector<8x8xf32>, vector<8x8xf32>, vector<8x8xf32> -> vector<8x8xf32>
    %77 = vector.extract_strided_slice %27 {offsets = [16, 0], sizes = [8, 32], strides = [1, 1]} : vector<32x32xf32> to vector<8x32xf32>
    %cst_43 = arith.constant dense<0.000000e+00> : vector<8x32xf32>
    %78 = tpu.matmul %76, %77, %cst_43 {dimension_numbers = #tpu.dot_dimension_numbers<[1], [0], [0], [1], [0, 0, 1, 1], [], []>} : vector<8x8xf32>, vector<8x32xf32>, vector<8x32xf32> -> vector<8x32xf32>
    %79 = arith.addf %62, %78 : vector<8x32xf32>
    %80 = vector.extract_strided_slice %11 {offsets = [0, 24], sizes = [8, 8], strides = [1, 1]} : vector<8x32xf32> to vector<8x8xf32>
    %81 = vector.extract_strided_slice %18 {offsets = [0, 24], sizes = [8, 8], strides = [1, 1]} : vector<8x32xf32> to vector<8x8xf32>
    %82 = vector.extract_strided_slice %25 {offsets = [0, 24], sizes = [8, 8], strides = [1, 1]} : vector<8x32xf32> to vector<8x8xf32>
    %cst_44 = arith.constant dense<0.000000e+00> : vector<8x8xf32>
    %83 = tpu.matmul %80, %81, %cst_44 {dimension_numbers = #tpu.dot_dimension_numbers<[1], [1], [0], [0], [0, 0, 1, 0], [], []>} : vector<8x8xf32>, vector<8x8xf32>, vector<8x8xf32> -> vector<8x8xf32>
    %cst_45 = arith.constant dense<0xFF800000> : vector<8xf32>
    %84 = vector.multi_reduction <maximumf>, %83, %cst_45 [1] : vector<8x8xf32> to vector<8xf32>
    %85 = vector.shape_cast %84 : vector<8xf32> to vector<8x1xf32>
    %86 = vector.broadcast %85 : vector<8x1xf32> to vector<8x8xf32>
    %87 = arith.subf %83, %86 : vector<8x8xf32>
    %88 = math.exp %87 : vector<8x8xf32>
    %cst_46 = arith.constant dense<0.000000e+00> : vector<8xf32>
    %89 = vector.multi_reduction <add>, %88, %cst_46 [1] : vector<8x8xf32> to vector<8xf32>
    %90 = vector.shape_cast %89 : vector<8xf32> to vector<8x1xf32>
    %91 = vector.broadcast %90 : vector<8x1xf32> to vector<8x8xf32>
    %92 = arith.divf %88, %91 : vector<8x8xf32>
    %cst_47 = arith.constant dense<0.000000e+00> : vector<8x8xf32>
    %93 = tpu.matmul %92, %82, %cst_47 {dimension_numbers = #tpu.dot_dimension_numbers<[1], [0], [0], [1], [0, 0, 1, 1], [], []>} : vector<8x8xf32>, vector<8x8xf32>, vector<8x8xf32> -> vector<8x8xf32>
    %94 = vector.extract_strided_slice %27 {offsets = [24, 0], sizes = [8, 32], strides = [1, 1]} : vector<32x32xf32> to vector<8x32xf32>
    %cst_48 = arith.constant dense<0.000000e+00> : vector<8x32xf32>
    %95 = tpu.matmul %93, %94, %cst_48 {dimension_numbers = #tpu.dot_dimension_numbers<[1], [0], [0], [1], [0, 0, 1, 1], [], []>} : vector<8x8xf32>, vector<8x32xf32>, vector<8x32xf32> -> vector<8x32xf32>
    %96 = arith.addf %79, %95 : vector<8x32xf32>
    %c0_49 = arith.constant 0 : index
    %c0_50 = arith.constant 0 : index
    %c0_51 = arith.constant 0 : index
    %97 = vector.load %arg10[%c0_49, %c0_50, %c0_51] : memref<2x1x32xf32, #tpu.memory_space<vmem>>, vector<1x1x32xf32>
    %98 = vector.shape_cast %97 : vector<1x1x32xf32> to vector<1x32xf32>
    %99 = vector.broadcast %98 : vector<1x32xf32> to vector<8x32xf32>
    %100 = arith.addf %96, %99 : vector<8x32xf32>
    %101 = arith.addf %1, %100 : vector<8x32xf32>
    %c0_52 = arith.constant 0 : index
    %c0_53 = arith.constant 0 : index
    %c0_54 = arith.constant 0 : index
    %102 = vector.load %arg15[%c0_52, %c0_53, %c0_54] : memref<2x1x32xf32, #tpu.memory_space<vmem>>, vector<1x1x32xf32>
    %103 = vector.shape_cast %102 : vector<1x1x32xf32> to vector<1x32xf32>
    %c0_55 = arith.constant 0 : index
    %c0_56 = arith.constant 0 : index
    %c0_57 = arith.constant 0 : index
    %104 = vector.load %arg16[%c0_55, %c0_56, %c0_57] : memref<2x1x32xf32, #tpu.memory_space<vmem>>, vector<1x1x32xf32>
    %105 = vector.shape_cast %104 : vector<1x1x32xf32> to vector<1x32xf32>
    %cst_58 = arith.constant dense<0.000000e+00> : vector<8xf32>
    %106 = vector.multi_reduction <add>, %101, %cst_58 [1] : vector<8x32xf32> to vector<8xf32>
    %107 = vector.shape_cast %106 : vector<8xf32> to vector<8x1xf32>
    %cst_59 = arith.constant 3.200000e+01 : f32
    %108 = vector.broadcast %cst_59 : f32 to vector<8x1xf32>
    %109 = arith.divf %107, %108 : vector<8x1xf32>
    %110 = vector.broadcast %109 : vector<8x1xf32> to vector<8x32xf32>
    %111 = arith.subf %101, %110 : vector<8x32xf32>
    %112 = arith.mulf %111, %111 : vector<8x32xf32>
    %cst_60 = arith.constant dense<0.000000e+00> : vector<8xf32>
    %113 = vector.multi_reduction <add>, %112, %cst_60 [1] : vector<8x32xf32> to vector<8xf32>
    %114 = vector.shape_cast %113 : vector<8xf32> to vector<8x1xf32>
    %cst_61 = arith.constant 3.200000e+01 : f32
    %115 = vector.broadcast %cst_61 : f32 to vector<8x1xf32>
    %116 = arith.divf %114, %115 : vector<8x1xf32>
    %cst_62 = arith.constant 9.99999974E-6 : f32
    %117 = vector.broadcast %cst_62 : f32 to vector<8x1xf32>
    %118 = arith.addf %116, %117 : vector<8x1xf32>
    %119 = math.rsqrt %118 : vector<8x1xf32>
    %120 = vector.broadcast %119 : vector<8x1xf32> to vector<8x32xf32>
    %121 = arith.mulf %111, %120 : vector<8x32xf32>
    %122 = vector.broadcast %103 : vector<1x32xf32> to vector<8x32xf32>
    %123 = arith.mulf %121, %122 : vector<8x32xf32>
    %124 = vector.broadcast %105 : vector<1x32xf32> to vector<8x32xf32>
    %125 = arith.addf %123, %124 : vector<8x32xf32>
    %c0_63 = arith.constant 0 : index
    %c0_64 = arith.constant 0 : index
    %c0_65 = arith.constant 0 : index
    %126 = vector.load %arg11[%c0_63, %c0_64, %c0_65] : memref<2x32x64xf32, #tpu.memory_space<vmem>>, vector<1x32x64xf32>
    %127 = vector.shape_cast %126 : vector<1x32x64xf32> to vector<32x64xf32>
    %cst_66 = arith.constant dense<0.000000e+00> : vector<8x64xf32>
    %128 = tpu.matmul %125, %127, %cst_66 {dimension_numbers = #tpu.dot_dimension_numbers<[1], [0], [0], [1], [0, 0, 1, 1], [], []>} : vector<8x32xf32>, vector<32x64xf32>, vector<8x64xf32> -> vector<8x64xf32>
    %c0_67 = arith.constant 0 : index
    %c0_68 = arith.constant 0 : index
    %c0_69 = arith.constant 0 : index
    %129 = vector.load %arg12[%c0_67, %c0_68, %c0_69] : memref<2x1x64xf32, #tpu.memory_space<vmem>>, vector<1x1x64xf32>
    %130 = vector.shape_cast %129 : vector<1x1x64xf32> to vector<1x64xf32>
    %131 = vector.broadcast %130 : vector<1x64xf32> to vector<8x64xf32>
    %132 = arith.addf %128, %131 : vector<8x64xf32>
    %cst_70 = arith.constant 0.000000e+00 : f32
    %133 = vector.broadcast %cst_70 : f32 to vector<8x64xf32>
    %134 = arith.maximumf %132, %133 : vector<8x64xf32>
    %c0_71 = arith.constant 0 : index
    %c0_72 = arith.constant 0 : index
    %c0_73 = arith.constant 0 : index
    %135 = vector.load %arg13[%c0_71, %c0_72, %c0_73] : memref<2x64x32xf32, #tpu.memory_space<vmem>>, vector<1x64x32xf32>
    %136 = vector.shape_cast %135 : vector<1x64x32xf32> to vector<64x32xf32>
    %cst_74 = arith.constant dense<0.000000e+00> : vector<8x32xf32>
    %137 = tpu.matmul %134, %136, %cst_74 {dimension_numbers = #tpu.dot_dimension_numbers<[1], [0], [0], [1], [0, 0, 1, 1], [], []>} : vector<8x64xf32>, vector<64x32xf32>, vector<8x32xf32> -> vector<8x32xf32>
    %c0_75 = arith.constant 0 : index
    %c0_76 = arith.constant 0 : index
    %c0_77 = arith.constant 0 : index
    %138 = vector.load %arg14[%c0_75, %c0_76, %c0_77] : memref<2x1x32xf32, #tpu.memory_space<vmem>>, vector<1x1x32xf32>
    %139 = vector.shape_cast %138 : vector<1x1x32xf32> to vector<1x32xf32>
    %140 = vector.broadcast %139 : vector<1x32xf32> to vector<8x32xf32>
    %141 = arith.addf %137, %140 : vector<8x32xf32>
    %142 = arith.addf %125, %141 : vector<8x32xf32>
    %c0_78 = arith.constant 0 : index
    %c0_79 = arith.constant 0 : index
    %c0_80 = arith.constant 0 : index
    %143 = vector.load %arg17[%c0_78, %c0_79, %c0_80] : memref<2x1x32xf32, #tpu.memory_space<vmem>>, vector<1x1x32xf32>
    %144 = vector.shape_cast %143 : vector<1x1x32xf32> to vector<1x32xf32>
    %c0_81 = arith.constant 0 : index
    %c0_82 = arith.constant 0 : index
    %c0_83 = arith.constant 0 : index
    %145 = vector.load %arg18[%c0_81, %c0_82, %c0_83] : memref<2x1x32xf32, #tpu.memory_space<vmem>>, vector<1x1x32xf32>
    %146 = vector.shape_cast %145 : vector<1x1x32xf32> to vector<1x32xf32>
    %cst_84 = arith.constant dense<0.000000e+00> : vector<8xf32>
    %147 = vector.multi_reduction <add>, %142, %cst_84 [1] : vector<8x32xf32> to vector<8xf32>
    %148 = vector.shape_cast %147 : vector<8xf32> to vector<8x1xf32>
    %cst_85 = arith.constant 3.200000e+01 : f32
    %149 = vector.broadcast %cst_85 : f32 to vector<8x1xf32>
    %150 = arith.divf %148, %149 : vector<8x1xf32>
    %151 = vector.broadcast %150 : vector<8x1xf32> to vector<8x32xf32>
    %152 = arith.subf %142, %151 : vector<8x32xf32>
    %153 = arith.mulf %152, %152 : vector<8x32xf32>
    %cst_86 = arith.constant dense<0.000000e+00> : vector<8xf32>
    %154 = vector.multi_reduction <add>, %153, %cst_86 [1] : vector<8x32xf32> to vector<8xf32>
    %155 = vector.shape_cast %154 : vector<8xf32> to vector<8x1xf32>
    %cst_87 = arith.constant 3.200000e+01 : f32
    %156 = vector.broadcast %cst_87 : f32 to vector<8x1xf32>
    %157 = arith.divf %155, %156 : vector<8x1xf32>
    %cst_88 = arith.constant 9.99999974E-6 : f32
    %158 = vector.broadcast %cst_88 : f32 to vector<8x1xf32>
    %159 = arith.addf %157, %158 : vector<8x1xf32>
    %160 = math.rsqrt %159 : vector<8x1xf32>
    %161 = vector.broadcast %160 : vector<8x1xf32> to vector<8x32xf32>
    %162 = arith.mulf %152, %161 : vector<8x32xf32>
    %163 = vector.broadcast %144 : vector<1x32xf32> to vector<8x32xf32>
    %164 = arith.mulf %162, %163 : vector<8x32xf32>
    %165 = vector.broadcast %146 : vector<1x32xf32> to vector<8x32xf32>
    %166 = arith.addf %164, %165 : vector<8x32xf32>
    %167 = arith.addf %166, %3 : vector<8x32xf32>
    %c1 = arith.constant 1 : index
    %c0_89 = arith.constant 0 : index
    %c0_90 = arith.constant 0 : index
    %168 = vector.load %arg3[%c1, %c0_89, %c0_90] : memref<2x32x32xf32, #tpu.memory_space<vmem>>, vector<1x32x32xf32>
    %169 = vector.shape_cast %168 : vector<1x32x32xf32> to vector<32x32xf32>
    %cst_91 = arith.constant dense<0.000000e+00> : vector<8x32xf32>
    %170 = tpu.matmul %167, %169, %cst_91 {dimension_numbers = #tpu.dot_dimension_numbers<[1], [0], [0], [1], [0, 0, 1, 1], [], []>} : vector<8x32xf32>, vector<32x32xf32>, vector<8x32xf32> -> vector<8x32xf32>
    %c1_92 = arith.constant 1 : index
    %c0_93 = arith.constant 0 : index
    %c0_94 = arith.constant 0 : index
    %171 = vector.load %arg6[%c1_92, %c0_93, %c0_94] : memref<2x1x32xf32, #tpu.memory_space<vmem>>, vector<1x1x32xf32>
    %172 = vector.shape_cast %171 : vector<1x1x32xf32> to vector<1x32xf32>
    %173 = vector.broadcast %172 : vector<1x32xf32> to vector<8x32xf32>
    %174 = arith.addf %170, %173 : vector<8x32xf32>
    %c1_95 = arith.constant 1 : index
    %c0_96 = arith.constant 0 : index
    %c0_97 = arith.constant 0 : index
    %175 = vector.load %arg4[%c1_95, %c0_96, %c0_97] : memref<2x32x32xf32, #tpu.memory_space<vmem>>, vector<1x32x32xf32>
    %176 = vector.shape_cast %175 : vector<1x32x32xf32> to vector<32x32xf32>
    %cst_98 = arith.constant dense<0.000000e+00> : vector<8x32xf32>
    %177 = tpu.matmul %167, %176, %cst_98 {dimension_numbers = #tpu.dot_dimension_numbers<[1], [0], [0], [1], [0, 0, 1, 1], [], []>} : vector<8x32xf32>, vector<32x32xf32>, vector<8x32xf32> -> vector<8x32xf32>
    %c1_99 = arith.constant 1 : index
    %c0_100 = arith.constant 0 : index
    %c0_101 = arith.constant 0 : index
    %178 = vector.load %arg7[%c1_99, %c0_100, %c0_101] : memref<2x1x32xf32, #tpu.memory_space<vmem>>, vector<1x1x32xf32>
    %179 = vector.shape_cast %178 : vector<1x1x32xf32> to vector<1x32xf32>
    %180 = vector.broadcast %179 : vector<1x32xf32> to vector<8x32xf32>
    %181 = arith.addf %177, %180 : vector<8x32xf32>
    %c1_102 = arith.constant 1 : index
    %c0_103 = arith.constant 0 : index
    %c0_104 = arith.constant 0 : index
    %182 = vector.load %arg5[%c1_102, %c0_103, %c0_104] : memref<2x32x32xf32, #tpu.memory_space<vmem>>, vector<1x32x32xf32>
    %183 = vector.shape_cast %182 : vector<1x32x32xf32> to vector<32x32xf32>
    %cst_105 = arith.constant dense<0.000000e+00> : vector<8x32xf32>
    %184 = tpu.matmul %166, %183, %cst_105 {dimension_numbers = #tpu.dot_dimension_numbers<[1], [0], [0], [1], [0, 0, 1, 1], [], []>} : vector<8x32xf32>, vector<32x32xf32>, vector<8x32xf32> -> vector<8x32xf32>
    %c1_106 = arith.constant 1 : index
    %c0_107 = arith.constant 0 : index
    %c0_108 = arith.constant 0 : index
    %185 = vector.load %arg8[%c1_106, %c0_107, %c0_108] : memref<2x1x32xf32, #tpu.memory_space<vmem>>, vector<1x1x32xf32>
    %186 = vector.shape_cast %185 : vector<1x1x32xf32> to vector<1x32xf32>
    %187 = vector.broadcast %186 : vector<1x32xf32> to vector<8x32xf32>
    %188 = arith.addf %184, %187 : vector<8x32xf32>
    %c1_109 = arith.constant 1 : index
    %c0_110 = arith.constant 0 : index
    %c0_111 = arith.constant 0 : index
    %189 = vector.load %arg9[%c1_109, %c0_110, %c0_111] : memref<2x32x32xf32, #tpu.memory_space<vmem>>, vector<1x32x32xf32>
    %190 = vector.shape_cast %189 : vector<1x32x32xf32> to vector<32x32xf32>
    %cst_112 = arith.constant 0.000000e+00 : f32
    %191 = vector.broadcast %cst_112 : f32 to vector<8x32xf32>
    %192 = vector.extract_strided_slice %174 {offsets = [0, 0], sizes = [8, 8], strides = [1, 1]} : vector<8x32xf32> to vector<8x8xf32>
    %193 = vector.extract_strided_slice %181 {offsets = [0, 0], sizes = [8, 8], strides = [1, 1]} : vector<8x32xf32> to vector<8x8xf32>
    %194 = vector.extract_strided_slice %188 {offsets = [0, 0], sizes = [8, 8], strides = [1, 1]} : vector<8x32xf32> to vector<8x8xf32>
    %cst_113 = arith.constant dense<0.000000e+00> : vector<8x8xf32>
    %195 = tpu.matmul %192, %193, %cst_113 {dimension_numbers = #tpu.dot_dimension_numbers<[1], [1], [0], [0], [0, 0, 1, 0], [], []>} : vector<8x8xf32>, vector<8x8xf32>, vector<8x8xf32> -> vector<8x8xf32>
    %cst_114 = arith.constant dense<0xFF800000> : vector<8xf32>
    %196 = vector.multi_reduction <maximumf>, %195, %cst_114 [1] : vector<8x8xf32> to vector<8xf32>
    %197 = vector.shape_cast %196 : vector<8xf32> to vector<8x1xf32>
    %198 = vector.broadcast %197 : vector<8x1xf32> to vector<8x8xf32>
    %199 = arith.subf %195, %198 : vector<8x8xf32>
    %200 = math.exp %199 : vector<8x8xf32>
    %cst_115 = arith.constant dense<0.000000e+00> : vector<8xf32>
    %201 = vector.multi_reduction <add>, %200, %cst_115 [1] : vector<8x8xf32> to vector<8xf32>
    %202 = vector.shape_cast %201 : vector<8xf32> to vector<8x1xf32>
    %203 = vector.broadcast %202 : vector<8x1xf32> to vector<8x8xf32>
    %204 = arith.divf %200, %203 : vector<8x8xf32>
    %cst_116 = arith.constant dense<0.000000e+00> : vector<8x8xf32>
    %205 = tpu.matmul %204, %194, %cst_116 {dimension_numbers = #tpu.dot_dimension_numbers<[1], [0], [0], [1], [0, 0, 1, 1], [], []>} : vector<8x8xf32>, vector<8x8xf32>, vector<8x8xf32> -> vector<8x8xf32>
    %206 = vector.extract_strided_slice %190 {offsets = [0, 0], sizes = [8, 32], strides = [1, 1]} : vector<32x32xf32> to vector<8x32xf32>
    %cst_117 = arith.constant dense<0.000000e+00> : vector<8x32xf32>
    %207 = tpu.matmul %205, %206, %cst_117 {dimension_numbers = #tpu.dot_dimension_numbers<[1], [0], [0], [1], [0, 0, 1, 1], [], []>} : vector<8x8xf32>, vector<8x32xf32>, vector<8x32xf32> -> vector<8x32xf32>
    %208 = arith.addf %191, %207 : vector<8x32xf32>
    %209 = vector.extract_strided_slice %174 {offsets = [0, 8], sizes = [8, 8], strides = [1, 1]} : vector<8x32xf32> to vector<8x8xf32>
    %210 = vector.extract_strided_slice %181 {offsets = [0, 8], sizes = [8, 8], strides = [1, 1]} : vector<8x32xf32> to vector<8x8xf32>
    %211 = vector.extract_strided_slice %188 {offsets = [0, 8], sizes = [8, 8], strides = [1, 1]} : vector<8x32xf32> to vector<8x8xf32>
    %cst_118 = arith.constant dense<0.000000e+00> : vector<8x8xf32>
    %212 = tpu.matmul %209, %210, %cst_118 {dimension_numbers = #tpu.dot_dimension_numbers<[1], [1], [0], [0], [0, 0, 1, 0], [], []>} : vector<8x8xf32>, vector<8x8xf32>, vector<8x8xf32> -> vector<8x8xf32>
    %cst_119 = arith.constant dense<0xFF800000> : vector<8xf32>
    %213 = vector.multi_reduction <maximumf>, %212, %cst_119 [1] : vector<8x8xf32> to vector<8xf32>
    %214 = vector.shape_cast %213 : vector<8xf32> to vector<8x1xf32>
    %215 = vector.broadcast %214 : vector<8x1xf32> to vector<8x8xf32>
    %216 = arith.subf %212, %215 : vector<8x8xf32>
    %217 = math.exp %216 : vector<8x8xf32>
    %cst_120 = arith.constant dense<0.000000e+00> : vector<8xf32>
    %218 = vector.multi_reduction <add>, %217, %cst_120 [1] : vector<8x8xf32> to vector<8xf32>
    %219 = vector.shape_cast %218 : vector<8xf32> to vector<8x1xf32>
    %220 = vector.broadcast %219 : vector<8x1xf32> to vector<8x8xf32>
    %221 = arith.divf %217, %220 : vector<8x8xf32>
    %cst_121 = arith.constant dense<0.000000e+00> : vector<8x8xf32>
    %222 = tpu.matmul %221, %211, %cst_121 {dimension_numbers = #tpu.dot_dimension_numbers<[1], [0], [0], [1], [0, 0, 1, 1], [], []>} : vector<8x8xf32>, vector<8x8xf32>, vector<8x8xf32> -> vector<8x8xf32>
    %223 = vector.extract_strided_slice %190 {offsets = [8, 0], sizes = [8, 32], strides = [1, 1]} : vector<32x32xf32> to vector<8x32xf32>
    %cst_122 = arith.constant dense<0.000000e+00> : vector<8x32xf32>
    %224 = tpu.matmul %222, %223, %cst_122 {dimension_numbers = #tpu.dot_dimension_numbers<[1], [0], [0], [1], [0, 0, 1, 1], [], []>} : vector<8x8xf32>, vector<8x32xf32>, vector<8x32xf32> -> vector<8x32xf32>
    %225 = arith.addf %208, %224 : vector<8x32xf32>
    %226 = vector.extract_strided_slice %174 {offsets = [0, 16], sizes = [8, 8], strides = [1, 1]} : vector<8x32xf32> to vector<8x8xf32>
    %227 = vector.extract_strided_slice %181 {offsets = [0, 16], sizes = [8, 8], strides = [1, 1]} : vector<8x32xf32> to vector<8x8xf32>
    %228 = vector.extract_strided_slice %188 {offsets = [0, 16], sizes = [8, 8], strides = [1, 1]} : vector<8x32xf32> to vector<8x8xf32>
    %cst_123 = arith.constant dense<0.000000e+00> : vector<8x8xf32>
    %229 = tpu.matmul %226, %227, %cst_123 {dimension_numbers = #tpu.dot_dimension_numbers<[1], [1], [0], [0], [0, 0, 1, 0], [], []>} : vector<8x8xf32>, vector<8x8xf32>, vector<8x8xf32> -> vector<8x8xf32>
    %cst_124 = arith.constant dense<0xFF800000> : vector<8xf32>
    %230 = vector.multi_reduction <maximumf>, %229, %cst_124 [1] : vector<8x8xf32> to vector<8xf32>
    %231 = vector.shape_cast %230 : vector<8xf32> to vector<8x1xf32>
    %232 = vector.broadcast %231 : vector<8x1xf32> to vector<8x8xf32>
    %233 = arith.subf %229, %232 : vector<8x8xf32>
    %234 = math.exp %233 : vector<8x8xf32>
    %cst_125 = arith.constant dense<0.000000e+00> : vector<8xf32>
    %235 = vector.multi_reduction <add>, %234, %cst_125 [1] : vector<8x8xf32> to vector<8xf32>
    %236 = vector.shape_cast %235 : vector<8xf32> to vector<8x1xf32>
    %237 = vector.broadcast %236 : vector<8x1xf32> to vector<8x8xf32>
    %238 = arith.divf %234, %237 : vector<8x8xf32>
    %cst_126 = arith.constant dense<0.000000e+00> : vector<8x8xf32>
    %239 = tpu.matmul %238, %228, %cst_126 {dimension_numbers = #tpu.dot_dimension_numbers<[1], [0], [0], [1], [0, 0, 1, 1], [], []>} : vector<8x8xf32>, vector<8x8xf32>, vector<8x8xf32> -> vector<8x8xf32>
    %240 = vector.extract_strided_slice %190 {offsets = [16, 0], sizes = [8, 32], strides = [1, 1]} : vector<32x32xf32> to vector<8x32xf32>
    %cst_127 = arith.constant dense<0.000000e+00> : vector<8x32xf32>
    %241 = tpu.matmul %239, %240, %cst_127 {dimension_numbers = #tpu.dot_dimension_numbers<[1], [0], [0], [1], [0, 0, 1, 1], [], []>} : vector<8x8xf32>, vector<8x32xf32>, vector<8x32xf32> -> vector<8x32xf32>
    %242 = arith.addf %225, %241 : vector<8x32xf32>
    %243 = vector.extract_strided_slice %174 {offsets = [0, 24], sizes = [8, 8], strides = [1, 1]} : vector<8x32xf32> to vector<8x8xf32>
    %244 = vector.extract_strided_slice %181 {offsets = [0, 24], sizes = [8, 8], strides = [1, 1]} : vector<8x32xf32> to vector<8x8xf32>
    %245 = vector.extract_strided_slice %188 {offsets = [0, 24], sizes = [8, 8], strides = [1, 1]} : vector<8x32xf32> to vector<8x8xf32>
    %cst_128 = arith.constant dense<0.000000e+00> : vector<8x8xf32>
    %246 = tpu.matmul %243, %244, %cst_128 {dimension_numbers = #tpu.dot_dimension_numbers<[1], [1], [0], [0], [0, 0, 1, 0], [], []>} : vector<8x8xf32>, vector<8x8xf32>, vector<8x8xf32> -> vector<8x8xf32>
    %cst_129 = arith.constant dense<0xFF800000> : vector<8xf32>
    %247 = vector.multi_reduction <maximumf>, %246, %cst_129 [1] : vector<8x8xf32> to vector<8xf32>
    %248 = vector.shape_cast %247 : vector<8xf32> to vector<8x1xf32>
    %249 = vector.broadcast %248 : vector<8x1xf32> to vector<8x8xf32>
    %250 = arith.subf %246, %249 : vector<8x8xf32>
    %251 = math.exp %250 : vector<8x8xf32>
    %cst_130 = arith.constant dense<0.000000e+00> : vector<8xf32>
    %252 = vector.multi_reduction <add>, %251, %cst_130 [1] : vector<8x8xf32> to vector<8xf32>
    %253 = vector.shape_cast %252 : vector<8xf32> to vector<8x1xf32>
    %254 = vector.broadcast %253 : vector<8x1xf32> to vector<8x8xf32>
    %255 = arith.divf %251, %254 : vector<8x8xf32>
    %cst_131 = arith.constant dense<0.000000e+00> : vector<8x8xf32>
    %256 = tpu.matmul %255, %245, %cst_131 {dimension_numbers = #tpu.dot_dimension_numbers<[1], [0], [0], [1], [0, 0, 1, 1], [], []>} : vector<8x8xf32>, vector<8x8xf32>, vector<8x8xf32> -> vector<8x8xf32>
    %257 = vector.extract_strided_slice %190 {offsets = [24, 0], sizes = [8, 32], strides = [1, 1]} : vector<32x32xf32> to vector<8x32xf32>
    %cst_132 = arith.constant dense<0.000000e+00> : vector<8x32xf32>
    %258 = tpu.matmul %256, %257, %cst_132 {dimension_numbers = #tpu.dot_dimension_numbers<[1], [0], [0], [1], [0, 0, 1, 1], [], []>} : vector<8x8xf32>, vector<8x32xf32>, vector<8x32xf32> -> vector<8x32xf32>
    %259 = arith.addf %242, %258 : vector<8x32xf32>
    %c1_133 = arith.constant 1 : index
    %c0_134 = arith.constant 0 : index
    %c0_135 = arith.constant 0 : index
    %260 = vector.load %arg10[%c1_133, %c0_134, %c0_135] : memref<2x1x32xf32, #tpu.memory_space<vmem>>, vector<1x1x32xf32>
    %261 = vector.shape_cast %260 : vector<1x1x32xf32> to vector<1x32xf32>
    %262 = vector.broadcast %261 : vector<1x32xf32> to vector<8x32xf32>
    %263 = arith.addf %259, %262 : vector<8x32xf32>
    %264 = arith.addf %166, %263 : vector<8x32xf32>
    %c1_136 = arith.constant 1 : index
    %c0_137 = arith.constant 0 : index
    %c0_138 = arith.constant 0 : index
    %265 = vector.load %arg15[%c1_136, %c0_137, %c0_138] : memref<2x1x32xf32, #tpu.memory_space<vmem>>, vector<1x1x32xf32>
    %266 = vector.shape_cast %265 : vector<1x1x32xf32> to vector<1x32xf32>
    %c1_139 = arith.constant 1 : index
    %c0_140 = arith.constant 0 : index
    %c0_141 = arith.constant 0 : index
    %267 = vector.load %arg16[%c1_139, %c0_140, %c0_141] : memref<2x1x32xf32, #tpu.memory_space<vmem>>, vector<1x1x32xf32>
    %268 = vector.shape_cast %267 : vector<1x1x32xf32> to vector<1x32xf32>
    %cst_142 = arith.constant dense<0.000000e+00> : vector<8xf32>
    %269 = vector.multi_reduction <add>, %264, %cst_142 [1] : vector<8x32xf32> to vector<8xf32>
    %270 = vector.shape_cast %269 : vector<8xf32> to vector<8x1xf32>
    %cst_143 = arith.constant 3.200000e+01 : f32
    %271 = vector.broadcast %cst_143 : f32 to vector<8x1xf32>
    %272 = arith.divf %270, %271 : vector<8x1xf32>
    %273 = vector.broadcast %272 : vector<8x1xf32> to vector<8x32xf32>
    %274 = arith.subf %264, %273 : vector<8x32xf32>
    %275 = arith.mulf %274, %274 : vector<8x32xf32>
    %cst_144 = arith.constant dense<0.000000e+00> : vector<8xf32>
    %276 = vector.multi_reduction <add>, %275, %cst_144 [1] : vector<8x32xf32> to vector<8xf32>
    %277 = vector.shape_cast %276 : vector<8xf32> to vector<8x1xf32>
    %cst_145 = arith.constant 3.200000e+01 : f32
    %278 = vector.broadcast %cst_145 : f32 to vector<8x1xf32>
    %279 = arith.divf %277, %278 : vector<8x1xf32>
    %cst_146 = arith.constant 9.99999974E-6 : f32
    %280 = vector.broadcast %cst_146 : f32 to vector<8x1xf32>
    %281 = arith.addf %279, %280 : vector<8x1xf32>
    %282 = math.rsqrt %281 : vector<8x1xf32>
    %283 = vector.broadcast %282 : vector<8x1xf32> to vector<8x32xf32>
    %284 = arith.mulf %274, %283 : vector<8x32xf32>
    %285 = vector.broadcast %266 : vector<1x32xf32> to vector<8x32xf32>
    %286 = arith.mulf %284, %285 : vector<8x32xf32>
    %287 = vector.broadcast %268 : vector<1x32xf32> to vector<8x32xf32>
    %288 = arith.addf %286, %287 : vector<8x32xf32>
    %c1_147 = arith.constant 1 : index
    %c0_148 = arith.constant 0 : index
    %c0_149 = arith.constant 0 : index
    %289 = vector.load %arg11[%c1_147, %c0_148, %c0_149] : memref<2x32x64xf32, #tpu.memory_space<vmem>>, vector<1x32x64xf32>
    %290 = vector.shape_cast %289 : vector<1x32x64xf32> to vector<32x64xf32>
    %cst_150 = arith.constant dense<0.000000e+00> : vector<8x64xf32>
    %291 = tpu.matmul %288, %290, %cst_150 {dimension_numbers = #tpu.dot_dimension_numbers<[1], [0], [0], [1], [0, 0, 1, 1], [], []>} : vector<8x32xf32>, vector<32x64xf32>, vector<8x64xf32> -> vector<8x64xf32>
    %c1_151 = arith.constant 1 : index
    %c0_152 = arith.constant 0 : index
    %c0_153 = arith.constant 0 : index
    %292 = vector.load %arg12[%c1_151, %c0_152, %c0_153] : memref<2x1x64xf32, #tpu.memory_space<vmem>>, vector<1x1x64xf32>
    %293 = vector.shape_cast %292 : vector<1x1x64xf32> to vector<1x64xf32>
    %294 = vector.broadcast %293 : vector<1x64xf32> to vector<8x64xf32>
    %295 = arith.addf %291, %294 : vector<8x64xf32>
    %cst_154 = arith.constant 0.000000e+00 : f32
    %296 = vector.broadcast %cst_154 : f32 to vector<8x64xf32>
    %297 = arith.maximumf %295, %296 : vector<8x64xf32>
    %c1_155 = arith.constant 1 : index
    %c0_156 = arith.constant 0 : index
    %c0_157 = arith.constant 0 : index
    %298 = vector.load %arg13[%c1_155, %c0_156, %c0_157] : memref<2x64x32xf32, #tpu.memory_space<vmem>>, vector<1x64x32xf32>
    %299 = vector.shape_cast %298 : vector<1x64x32xf32> to vector<64x32xf32>
    %cst_158 = arith.constant dense<0.000000e+00> : vector<8x32xf32>
    %300 = tpu.matmul %297, %299, %cst_158 {dimension_numbers = #tpu.dot_dimension_numbers<[1], [0], [0], [1], [0, 0, 1, 1], [], []>} : vector<8x64xf32>, vector<64x32xf32>, vector<8x32xf32> -> vector<8x32xf32>
    %c1_159 = arith.constant 1 : index
    %c0_160 = arith.constant 0 : index
    %c0_161 = arith.constant 0 : index
    %301 = vector.load %arg14[%c1_159, %c0_160, %c0_161] : memref<2x1x32xf32, #tpu.memory_space<vmem>>, vector<1x1x32xf32>
    %302 = vector.shape_cast %301 : vector<1x1x32xf32> to vector<1x32xf32>
    %303 = vector.broadcast %302 : vector<1x32xf32> to vector<8x32xf32>
    %304 = arith.addf %300, %303 : vector<8x32xf32>
    %305 = arith.addf %288, %304 : vector<8x32xf32>
    %c1_162 = arith.constant 1 : index
    %c0_163 = arith.constant 0 : index
    %c0_164 = arith.constant 0 : index
    %306 = vector.load %arg17[%c1_162, %c0_163, %c0_164] : memref<2x1x32xf32, #tpu.memory_space<vmem>>, vector<1x1x32xf32>
    %307 = vector.shape_cast %306 : vector<1x1x32xf32> to vector<1x32xf32>
    %c1_165 = arith.constant 1 : index
    %c0_166 = arith.constant 0 : index
    %c0_167 = arith.constant 0 : index
    %308 = vector.load %arg18[%c1_165, %c0_166, %c0_167] : memref<2x1x32xf32, #tpu.memory_space<vmem>>, vector<1x1x32xf32>
    %309 = vector.shape_cast %308 : vector<1x1x32xf32> to vector<1x32xf32>
    %cst_168 = arith.constant dense<0.000000e+00> : vector<8xf32>
    %310 = vector.multi_reduction <add>, %305, %cst_168 [1] : vector<8x32xf32> to vector<8xf32>
    %311 = vector.shape_cast %310 : vector<8xf32> to vector<8x1xf32>
    %cst_169 = arith.constant 3.200000e+01 : f32
    %312 = vector.broadcast %cst_169 : f32 to vector<8x1xf32>
    %313 = arith.divf %311, %312 : vector<8x1xf32>
    %314 = vector.broadcast %313 : vector<8x1xf32> to vector<8x32xf32>
    %315 = arith.subf %305, %314 : vector<8x32xf32>
    %316 = arith.mulf %315, %315 : vector<8x32xf32>
    %cst_170 = arith.constant dense<0.000000e+00> : vector<8xf32>
    %317 = vector.multi_reduction <add>, %316, %cst_170 [1] : vector<8x32xf32> to vector<8xf32>
    %318 = vector.shape_cast %317 : vector<8xf32> to vector<8x1xf32>
    %cst_171 = arith.constant 3.200000e+01 : f32
    %319 = vector.broadcast %cst_171 : f32 to vector<8x1xf32>
    %320 = arith.divf %318, %319 : vector<8x1xf32>
    %cst_172 = arith.constant 9.99999974E-6 : f32
    %321 = vector.broadcast %cst_172 : f32 to vector<8x1xf32>
    %322 = arith.addf %320, %321 : vector<8x1xf32>
    %323 = math.rsqrt %322 : vector<8x1xf32>
    %324 = vector.broadcast %323 : vector<8x1xf32> to vector<8x32xf32>
    %325 = arith.mulf %315, %324 : vector<8x32xf32>
    %326 = vector.broadcast %307 : vector<1x32xf32> to vector<8x32xf32>
    %327 = arith.mulf %325, %326 : vector<8x32xf32>
    %328 = vector.broadcast %309 : vector<1x32xf32> to vector<8x32xf32>
    %329 = arith.addf %327, %328 : vector<8x32xf32>
    %c0_173 = arith.constant 0 : index
    %c0_174 = arith.constant 0 : index
    %330 = vector.load %arg19[%c0_173, %c0_174] : memref<1x32xf32, #tpu.memory_space<vmem>>, vector<1x32xf32>
    %c0_175 = arith.constant 0 : index
    %c0_176 = arith.constant 0 : index
    %331 = vector.load %arg20[%c0_175, %c0_176] : memref<1x32xf32, #tpu.memory_space<vmem>>, vector<1x32xf32>
    %cst_177 = arith.constant dense<0.000000e+00> : vector<8xf32>
    %332 = vector.multi_reduction <add>, %329, %cst_177 [1] : vector<8x32xf32> to vector<8xf32>
    %333 = vector.shape_cast %332 : vector<8xf32> to vector<8x1xf32>
    %cst_178 = arith.constant 3.200000e+01 : f32
    %334 = vector.broadcast %cst_178 : f32 to vector<8x1xf32>
    %335 = arith.divf %333, %334 : vector<8x1xf32>
    %336 = vector.broadcast %335 : vector<8x1xf32> to vector<8x32xf32>
    %337 = arith.subf %329, %336 : vector<8x32xf32>
    %338 = arith.mulf %337, %337 : vector<8x32xf32>
    %cst_179 = arith.constant dense<0.000000e+00> : vector<8xf32>
    %339 = vector.multi_reduction <add>, %338, %cst_179 [1] : vector<8x32xf32> to vector<8xf32>
    %340 = vector.shape_cast %339 : vector<8xf32> to vector<8x1xf32>
    %cst_180 = arith.constant 3.200000e+01 : f32
    %341 = vector.broadcast %cst_180 : f32 to vector<8x1xf32>
    %342 = arith.divf %340, %341 : vector<8x1xf32>
    %cst_181 = arith.constant 9.99999974E-6 : f32
    %343 = vector.broadcast %cst_181 : f32 to vector<8x1xf32>
    %344 = arith.addf %342, %343 : vector<8x1xf32>
    %345 = math.rsqrt %344 : vector<8x1xf32>
    %346 = vector.broadcast %345 : vector<8x1xf32> to vector<8x32xf32>
    %347 = arith.mulf %337, %346 : vector<8x32xf32>
    %348 = vector.broadcast %330 : vector<1x32xf32> to vector<8x32xf32>
    %349 = arith.mulf %347, %348 : vector<8x32xf32>
    %350 = vector.broadcast %331 : vector<1x32xf32> to vector<8x32xf32>
    %351 = arith.addf %349, %350 : vector<8x32xf32>
    %c0_182 = arith.constant 0 : index
    %c0_183 = arith.constant 0 : index
    %c0_184 = arith.constant 0 : index
    %352 = vector.load %arg21[%c0_182, %c0_183, %c0_184] : memref<1x8x32xf32, #tpu.memory_space<vmem>>, vector<1x8x32xf32>
    %353 = vector.shape_cast %352 : vector<1x8x32xf32> to vector<8x32xf32>
    %354 = vector.shape_cast %351 : vector<8x32xf32> to vector<1x8x32xf32>
    tpu.vector_store %arg21[%c0_182, %c0_183, %c0_184], %354 {strides = array<i32>} : memref<1x8x32xf32, #tpu.memory_space<vmem>>, vector<1x8x32xf32>,
    return
  }
  func.func @transform_0(%arg0: i32) -> (i32, i32, i32) {
    %c0_i32 = arith.constant 0 : i32
    %c0_i32_0 = arith.constant 0 : i32
    %c0_i32_1 = arith.constant 0 : i32
    return %arg0, %c0_i32, %c0_i32_0 : i32, i32, i32
  }
  func.func @transform_1(%arg0: i32) -> (i32, i32, i32) {
    %c0_i32 = arith.constant 0 : i32
    %c0_i32_0 = arith.constant 0 : i32
    %c0_i32_1 = arith.constant 0 : i32
    return %arg0, %c0_i32, %c0_i32_0 : i32, i32, i32
  }
  func.func @transform_2(%arg0: i32) -> (i32, i32, i32) {
    %c0_i32 = arith.constant 0 : i32
    %c0_i32_0 = arith.constant 0 : i32
    %c0_i32_1 = arith.constant 0 : i32
    %c0_i32_2 = arith.constant 0 : i32
    return %c0_i32, %c0_i32_0, %c0_i32_1 : i32, i32, i32
  }
  func.func @transform_3(%arg0: i32) -> (i32, i32, i32) {
    %c0_i32 = arith.constant 0 : i32
    %c0_i32_0 = arith.constant 0 : i32
    %c0_i32_1 = arith.constant 0 : i32
    %c0_i32_2 = arith.constant 0 : i32
    return %c0_i32, %c0_i32_0, %c0_i32_1 : i32, i32, i32
  }
  func.func @transform_4(%arg0: i32) -> (i32, i32, i32) {
    %c0_i32 = arith.constant 0 : i32
    %c0_i32_0 = arith.constant 0 : i32
    %c0_i32_1 = arith.constant 0 : i32
    %c0_i32_2 = arith.constant 0 : i32
    return %c0_i32, %c0_i32_0, %c0_i32_1 : i32, i32, i32
  }
  func.func @transform_5(%arg0: i32) -> (i32, i32, i32) {
    %c0_i32 = arith.constant 0 : i32
    %c0_i32_0 = arith.constant 0 : i32
    %c0_i32_1 = arith.constant 0 : i32
    %c0_i32_2 = arith.constant 0 : i32
    return %c0_i32, %c0_i32_0, %c0_i32_1 : i32, i32, i32
  }
  func.func @transform_6(%arg0: i32) -> (i32, i32, i32) {
    %c0_i32 = arith.constant 0 : i32
    %c0_i32_0 = arith.constant 0 : i32
    %c0_i32_1 = arith.constant 0 : i32
    %c0_i32_2 = arith.constant 0 : i32
    return %c0_i32, %c0_i32_0, %c0_i32_1 : i32, i32, i32
  }
  func.func @transform_7(%arg0: i32) -> (i32, i32, i32) {
    %c0_i32 = arith.constant 0 : i32
    %c0_i32_0 = arith.constant 0 : i32
    %c0_i32_1 = arith.constant 0 : i32
    %c0_i32_2 = arith.constant 0 : i32
    return %c0_i32, %c0_i32_0, %c0_i32_1 : i32, i32, i32
  }
  func.func @transform_8(%arg0: i32) -> (i32, i32, i32) {
    %c0_i32 = arith.constant 0 : i32
    %c0_i32_0 = arith.constant 0 : i32
    %c0_i32_1 = arith.constant 0 : i32
    %c0_i32_2 = arith.constant 0 : i32
    return %c0_i32, %c0_i32_0, %c0_i32_1 : i32, i32, i32
  }
  func.func @transform_9(%arg0: i32) -> (i32, i32, i32) {
    %c0_i32 = arith.constant 0 : i32
    %c0_i32_0 = arith.constant 0 : i32
    %c0_i32_1 = arith.constant 0 : i32
    %c0_i32_2 = arith.constant 0 : i32
    return %c0_i32, %c0_i32_0, %c0_i32_1 : i32, i32, i32
  }
  func.func @transform_10(%arg0: i32) -> (i32, i32, i32) {
    %c0_i32 = arith.constant 0 : i32
    %c0_i32_0 = arith.constant 0 : i32
    %c0_i32_1 = arith.constant 0 : i32
    %c0_i32_2 = arith.constant 0 : i32
    return %c0_i32, %c0_i32_0, %c0_i32_1 : i32, i32, i32
  }
  func.func @transform_11(%arg0: i32) -> (i32, i32, i32) {
    %c0_i32 = arith.constant 0 : i32
    %c0_i32_0 = arith.constant 0 : i32
    %c0_i32_1 = arith.constant 0 : i32
    %c0_i32_2 = arith.constant 0 : i32
    return %c0_i32, %c0_i32_0, %c0_i32_1 : i32, i32, i32
  }
  func.func @transform_12(%arg0: i32) -> (i32, i32, i32) {
    %c0_i32 = arith.constant 0 : i32
    %c0_i32_0 = arith.constant 0 : i32
    %c0_i32_1 = arith.constant 0 : i32
    %c0_i32_2 = arith.constant 0 : i32
    return %c0_i32, %c0_i32_0, %c0_i32_1 : i32, i32, i32
  }
  func.func @transform_13(%arg0: i32) -> (i32, i32, i32) {
    %c0_i32 = arith.constant 0 : i32
    %c0_i32_0 = arith.constant 0 : i32
    %c0_i32_1 = arith.constant 0 : i32
    %c0_i32_2 = arith.constant 0 : i32
    return %c0_i32, %c0_i32_0, %c0_i32_1 : i32, i32, i32
  }
  func.func @transform_14(%arg0: i32) -> (i32, i32, i32) {
    %c0_i32 = arith.constant 0 : i32
    %c0_i32_0 = arith.constant 0 : i32
    %c0_i32_1 = arith.constant 0 : i32
    %c0_i32_2 = arith.constant 0 : i32
    return %c0_i32, %c0_i32_0, %c0_i32_1 : i32, i32, i32
  }
  func.func @transform_15(%arg0: i32) -> (i32, i32, i32) {
    %c0_i32 = arith.constant 0 : i32
    %c0_i32_0 = arith.constant 0 : i32
    %c0_i32_1 = arith.constant 0 : i32
    %c0_i32_2 = arith.constant 0 : i32
    return %c0_i32, %c0_i32_0, %c0_i32_1 : i32, i32, i32
  }
  func.func @transform_16(%arg0: i32) -> (i32, i32, i32) {
    %c0_i32 = arith.constant 0 : i32
    %c0_i32_0 = arith.constant 0 : i32
    %c0_i32_1 = arith.constant 0 : i32
    %c0_i32_2 = arith.constant 0 : i32
    return %c0_i32, %c0_i32_0, %c0_i32_1 : i32, i32, i32
  }
  func.func @transform_17(%arg0: i32) -> (i32, i32, i32) {
    %c0_i32 = arith.constant 0 : i32
    %c0_i32_0 = arith.constant 0 : i32
    %c0_i32_1 = arith.constant 0 : i32
    %c0_i32_2 = arith.constant 0 : i32
    return %c0_i32, %c0_i32_0, %c0_i32_1 : i32, i32, i32
  }
  func.func @transform_18(%arg0: i32) -> (i32, i32) {
    %c0_i32 = arith.constant 0 : i32
    %c0_i32_0 = arith.constant 0 : i32
    %c0_i32_1 = arith.constant 0 : i32
    return %c0_i32, %c0_i32_0 : i32, i32
  }
  func.func @transform_19(%arg0: i32) -> (i32, i32) {
    %c0_i32 = arith.constant 0 : i32
    %c0_i32_0 = arith.constant 0 : i32
    %c0_i32_1 = arith.constant 0 : i32
    return %c0_i32, %c0_i32_0 : i32, i32
  }
  func.func @transform_20(%arg0: i32) -> (i32, i32, i32) {
    %c0_i32 = arith.constant 0 : i32
    %c0_i32_0 = arith.constant 0 : i32
    %c0_i32_1 = arith.constant 0 : i32
    return %arg0, %c0_i32, %c0_i32_0 : i32, i32, i32
  }
}

</mosaic_0001>

<bundles_post_ra>
// kernel: tpu_custom_call.1
= control target key start
LH: loop header
LB: loop body
LE: loop exit
PB: predicated region body
PF: predicated region fallthrough
CT: control target
= control target key end

     0   :  { %s3444_s0 = inlined_call_operand.hbm [shape: f32[2,8,32], index: 0, kind: input, shape index: {}]   ;;  %s3445_s1 = inlined_call_operand.hbm [shape: f32[2,8,32], index: 1, kind: input, shape index: {}]   ;;  %s3446_s2 = inlined_call_operand.vmem [shape: f32[2,32,32], index: 2, kind: input, shape index: {}]   ;;  %s3447_s3 = inlined_call_operand.vmem [shape: f32[2,32,32], index: 3, kind: input, shape index: {}]   ;;  %s3448_s4 = inlined_call_operand.vmem [shape: f32[2,32,32], index: 4, kind: input, shape index: {}]   ;;  %s3449_s5 = inlined_call_operand.vmem [shape: f32[2,1,32], index: 5, kind: input, shape index: {}]   ;;  %s3450_s6 = inlined_call_operand.vmem [shape: f32[2,1,32], index: 6, kind: input, shape index: {}]   ;;  %s3451_s7 = inlined_call_operand.hbm [shape: f32[2,1,32], index: 7, kind: input, shape index: {}]   ;;  %s3452_s8 = inlined_call_operand.hbm [shape: f32[2,32,32], index: 8, kind: input, shape index: {}]   ;;  %s3453_s9 = inlined_call_operand.vmem [shape: f32[2,1,32], index: 9, kind: input, shape index: {}]   ;;  %s3454_s10 = inlined_call_operand.hbm [shape: f32[2,32,64], index: 10, kind: input, shape index: {}]   ;;  %s3455_s11 = inlined_call_operand.vmem [shape: f32[2,1,64], index: 11, kind: input, shape index: {}]   ;;  %s3456_s12 = inlined_call_operand.vmem [shape: f32[2,64,32], index: 12, kind: input, shape index: {}]   ;;  %s3457_s13 = inlined_call_operand.vmem [shape: f32[2,1,32], index: 13, kind: input, shape index: {}]   ;;  %s3458_s14 = inlined_call_operand.hbm [shape: f32[2,1,32], index: 14, kind: input, shape index: {}]   ;;  %s3459_s15 = inlined_call_operand.vmem [shape: f32[2,1,32], index: 15, kind: input, shape index: {}]   ;;  %s3460_s16 = inlined_call_operand.vmem [shape: f32[2,1,32], index: 16, kind: input, shape index: {}]   ;;  %s3461_s17 = inlined_call_operand.hbm [shape: f32[2,1,32], index: 17, kind: input, shape index: {}]   ;;  %s3462_s18 = inlined_call_operand.vmem [shape: f32[1,32], index: 18, kind: input, shape index: {}]   ;;  %s3463_s19 = inlined_call_operand.vmem [shape: f32[1,32], index: 19, kind: input, shape index: {}]   ;;  %s3464_s20 = inlined_call_operand.hbm [shape: f32[2,8,32], index: 20, kind: output, shape index: {}]  }
   0x1   :  { %3479 = sst [smem:[#allocation27_spill]] %s3444_s0 }
   0x2   :  { %3480 = sst [smem:[#allocation28_spill]] %s3445_s1 }
   0x3   :  { %3481 = sst [smem:[#allocation29_spill]] %s3446_s2 }
   0x4   :  { %3482 = sst [smem:[#allocation30_spill]] %s3447_s3 }
   0x5   :  { %3483 = sst [smem:[#allocation31_spill]] %s3448_s4 }
   0x6   :  { %3484 = sst [smem:[#allocation32_spill]] %s3451_s7 }
   0x7   :  { %3485 = sst [smem:[#allocation33_spill]] %s3452_s8 }
   0x8   :  { %3486 = sst [smem:[#allocation34_spill]] %s3454_s10 }
   0x9   :  { %3487 = sst [smem:[#allocation35_spill]] %s3457_s13 }
   0xa   :  { %3488 = sst [smem:[#allocation36_spill]] %s3458_s14 }
   0xb   :  { %3489 = sst [smem:[#allocation37_spill]] %s3460_s16 }
   0xc   :  { %3490 = sst [smem:[#allocation38_spill]] %s3461_s17 }
   0xd   :  { %3491 = sst [smem:[#allocation39_spill]] %s3462_s18 }
   0xe   :  { %3492 = sst [smem:[#allocation40_spill]] %s3463_s19 }
   0xf   :  { %3493 = sst [smem:[#allocation41_spill]] %s3464_s20 }
  0x10   :  { %25 = vsyncpa [#allocation3], 0 }
  0x11   :  { %27 = vsyncpa [#allocation3 + $0x1], 0 }
  0x12   :  { %28 = vsyncpa [#allocation6], 0 }
  0x13   :  { %30 = vsyncpa [#allocation6 + $0x1], 0 }
  0x14   :  { %31 = vsyncpa [#allocation9], 0 }
  0x15   :  { %32 = vsyncpa [#allocation12], 0 }
  0x16   :  { %33 = vsyncpa [#allocation4], 0 }
  0x17   :  { %35 = vsyncpa [#allocation4 + $0x1], 0  ;;  %s2937_s1 = smov 0   ;;  %s2939_s22 = smov 0  }
  0x18   :  { %s2941_s23 = smov 0   ;;  %s2943_s24 = smov 0  }
  0x19 LB: > { %3494 = sst [smem:[#allocation21_spill]] %s2805_s1  ;;  %s2961_s26 = sadd.s32 4294967295, %s2817_s24   ;;  %s2817_s24 = sphi %s2943_s24, %s3526_s24   ;;  %s2813_s23 = sphi %s2941_s23, %s3528_s23   ;;  %s2809_s22 = sphi %s2939_s22, %s3530_s22   ;;  %s2805_s1 = sphi %s2937_s1, %s3529_s1  }
  0x1a   : > { %3495 = sst [smem:[#allocation22_spill]] %s2813_s23  ;;  %p2256_p0 = scmp.ge.s32.totalorder %s2817_s24, 1 }
  0x1b   : > { %3496 = sst [smem:[#allocation23_spill]] %s2817_s24  ;;  %p62_p1 = scmp.eq.s32.totalorder %s2961_s26, 0 }
  0x1c   : > { %s3497_s7 = sld [smem:[#allocation32_spill]]  ;;  %p502_p2 = scmp.lt.s32.totalorder %s2817_s24, 3 }
  0x1d   : > { %s2819_s28 = smov [#allocation7]   ;;  %s3499_s8 = sld [smem:[#allocation33_spill]] }
  0x1e   : > { %p2966_p3 = pnand %p2256_p0, %p502_p2  ;;  %s530_s4 = sshll.u32 %s2819_s28, 4  ;;  %s531_s4 = int_to_ptr.vmem [resolvable:$true] %s530_s4 }
  0x1f   : > { %s2820_s2 = smov [#allocation8]   ;;  %s2821_s28 = smov 16  }
  0x20   : > { %p2375_p4 = pneg %p2966_p3  ;;  %s544_s25 = sshll.u32 %s2820_s2, 4  ;;  %s545_s25 = int_to_ptr.vmem [resolvable:$true] %s544_s25 }
  0x21   : > { %s2823_s19 = smov 128   ;;  %s2824_s29 = smov 8  }
  0x22   : > { %s528_s3 = sshll.u32 %s3497_s7, 4  ;;  %p2978_p6 = pnand %p2375_p4, %p62_p1  ;;  %s529_s3 = int_to_ptr.hbm [resolvable:$true] %s528_s3 }
  0x23   : > { %s542_s0 = sshll.u32 %s3499_s8, 4  ;;  %s2822_s7 = smov 1   ;;  %s543_s0 = int_to_ptr.hbm [resolvable:$true] %s542_s0 }
  0x24   : > { %2378 = dma.hbm_to_vmem [thread:$0]  (!%p2978_p6), %s529_s3, 32, %s531_s4, [#allocation6], %s2821_s28, %s2821_s28, %s2822_s7  }
  0x25   : > { %2381 = dma.hbm_to_vmem [thread:$0]  (!%p2978_p6), %s543_s0, 1024, %s545_s25, [#allocation9], %s2823_s19, %s2823_s19, %s2824_s29  }
  0x26   : > { %s3501_s14 = sld [smem:[#allocation36_spill]]  ;;  %s2825_s18 = smov [#allocation11]  }
  0x27   : > { %s584_s16 = sshll.u32 %s2825_s18, 4  ;;  %s3502_s10 = sld [smem:[#allocation34_spill]]  ;;  %s585_s16 = int_to_ptr.vmem [resolvable:$true] %s584_s16 }
  0x28   : > { %s2826_s8 = smov [#allocation10]   ;;  %s3503_s17 = sld [smem:[#allocation38_spill]] }
  0x29   : > { %s561_s4 = sshll.u32 %s2826_s8, 4  ;;  %s2827_s13 = smov [#allocation13]   ;;  %s562_s4 = int_to_ptr.vmem [resolvable:$true] %s561_s4 }
  0x2a   : > { %s3003_s30 = sadd.s32 1, %s2817_s24   ;;  %s48_s2 = sadd.s32 1, %s2813_s23 }
  0x2b   : > { %3504 = sst [smem:[#allocation24_spill]] %s3003_s30  ;;  %s45_s8 = ssub.s32 %s2817_s24, %s3003_s30 }
  0x2c   : > { %s582_s20 = sshll.u32 %s3501_s14, 4  ;;  %p55_p7 = scmp.ne.s32.totalorder %s2813_s23, %s2809_s22  ;;  %s583_s20 = int_to_ptr.hbm [resolvable:$true] %s582_s20 }
  0x2d   : > { %s559_s3 = sshll.u32 %s3502_s10, 4  ;;  %p46_p8 = scmp.eq.s32.totalorder %s45_s8, 0  ;;  %s560_s3 = int_to_ptr.hbm [resolvable:$true] %s559_s3 }
  0x2e   : > { %2387 = dma.hbm_to_vmem [thread:$0]  (!%p2978_p6), %s583_s20, 32, %s585_s16, [#allocation12], %s2821_s28, %s2821_s28, %s2822_s7  }
  0x2f   : > { %s602_s18 = sshll.u32 %s3503_s17, 4  ;;  %s604_s16 = sshll.u32 %s2827_s13, 4  ;;  %s603_s18 = int_to_ptr.hbm [resolvable:$true] %s602_s18  ;;  %s605_s16 = int_to_ptr.vmem [resolvable:$true] %s604_s16 }
  0x30   : > { %2384 = dma.hbm_to_vmem [thread:$0]  (!%p2978_p6), %s560_s3, 1024, %s562_s4, [#allocation9], %s2823_s19, %s2823_s19, %s2824_s29  }
  0x31   : > { %2390 = dma.hbm_to_vmem [thread:$0]  (!%p2978_p6), %s603_s18, 32, %s605_s16, [#allocation12], %s2821_s28, %s2821_s28, %s2822_s7  }
  0x32   : > { %s2255_s20 = sadd.s32 4294967294, %s2817_s24   ;;  %p56_p9 = scmp.eq.s32.totalorder %s2817_s24, 0 }
  0x33   : > { %p61_p10 = scmp.ne.s32.totalorder %s2809_s22, %s2805_s1  ;;  %p489_p11 = scmp.eq.s32.totalorder %s2961_s26, 1 }
  0x34   : > { %s3015_s19 = scalar_select %p46_p8, %s2813_s23, %s48_s2  }
  0x35   : > { %p3017_p12 = por %p56_p9, %p55_p7  ;;  %p3023_p13 = por %p62_p1, %p61_p10 }
  0x36   : > { %3505 = sst [smem:[#allocation25_spill]] %s3015_s19  ;;  %p3027_p0 = por %p489_p11, %p55_p7 }
  0x37   : > { %p495_p2 = scmp.eq.s32.totalorder %s2255_s20, 1  ;;  %p2407_p4 = scmp.lt.s32.totalorder %s2817_s24, 2 }
  0x38   : > { %s624_s28 = sand.u32 1, %s2813_s23   ;;  %s2264_s0 = sshll.u32 %s2817_s24, 3 }
  0x39   : > { %p3033_p6 = por %p495_p2, %p61_p10  ;;  %s2263_s4 = sshll.u32 %s624_s28, 3 }
  0x3a   : > { %s3511_s13 = sld [smem:[#allocation27_spill]]  ;;  %s628_s8 = scalar_lea.vmem [#allocation2], %s2263_s4 }
  0x3b   : > { %s3509_s3 = scalar_select %p3033_p6, 1, 0 }
  0x3c   : > { %s636_s10 = sshll.u32 %s628_s8, 4  ;;  %p3043_p7 = pnand %p2407_p4, %p3017_p12  ;;  %s637_s10 = int_to_ptr.vmem [resolvable:$true] %s636_s10 }
  0x3d   : > { %3510 = sst [smem:[#allocation26_spill]] %s3509_s3  ;;  %s643_s30 = sand.u32 1, %s2817_s24  }
  0x3e   : > { %s3513_s19 = sld [smem:[#allocation28_spill]]  ;;  %s625_s3 = scalar_lea.sflag [#allocation3], %s624_s28 }
  0x3f   : > { %p2679_p9 = pneg %p3043_p7 }
  0x40   : > { %s632_s16 = scalar_lea.hbm %s3511_s13, %s2264_s0  ;;  %s2682_s8 = scalar_lea.hbm %s3511_s13, 16 }
  0x41   : > { %s634_s2 = sshll.u32 %s632_s16, 4  ;;  %s635_s2 = int_to_ptr.hbm [resolvable:$true] %s634_s2 }
  0x42   : > { %s2675_s25 = sshra.s32 %s635_s2, 4  ;;  %s2676_s25 = int_to_ptr.hbm [resolvable:$true] %s2675_s25 }
  0x43   : > { %s2677_s18 = scalar_lea.hbm %s2676_s25, 8  ;;  %p2683_p12 = scmp.lt.s32.totalorder %s2676_s25, %s3511_s13 }
  0x44   : > { %s651_s23 = scalar_lea.hbm %s3513_s19, %s2264_s0  ;;  %p2678_p8 = scmp.ne.s32.totalorder %s2676_s25, %s2677_s18 }
  0x45   : > { %p2684_p2 = scmp.lt.s32.totalorder %s2682_s8, %s2677_s18 }
  0x46   : > { %p2680_p10 = pnand %p2679_p9, %p2678_p8 }
  0x47   : > { %p2685_p4 = por %p2684_p2, %p2683_p12 }
  0x48   : > { %p2681_p11 = pneg %p2680_p10 }
  0x4a   : > { %p2686_p5 = pnand %p2685_p4, %p2681_p11 }
  0x4c   : > { %2689 = shalt.err (!%p2686_p5)
}
  0x4d   : > { %2394 = dma.hbm_to_vmem [thread:$0]  (!%p3043_p7), %s635_s2, 128, %s637_s10, %s625_s3  }
  0x4e   : > { %s653_s28 = sshll.u32 %s651_s23, 4  ;;  %s647_s0 = scalar_lea.vmem [#allocation5], %s2263_s4  ;;  %s654_s28 = int_to_ptr.hbm [resolvable:$true] %s653_s28 }
  0x4f   : > { %s655_s24 = sshll.u32 %s647_s0, 4  ;;  %s644_s1 = scalar_lea.sflag [#allocation6], %s643_s30  ;;  %s656_s24 = int_to_ptr.vmem [resolvable:$true] %s655_s24 }
  0x50   : > { %s2705_s29 = sshra.s32 %s654_s28, 4  ;;  %s2712_s8 = scalar_lea.hbm %s3513_s19, 16  ;;  %s2706_s29 = int_to_ptr.hbm [resolvable:$true] %s2705_s29 }
  0x51   : > { %s2707_s16 = scalar_lea.hbm %s2706_s29, 8  ;;  %p2713_p5 = scmp.lt.s32.totalorder %s2706_s29, %s3513_s19 }
  0x52   : > { %p2708_p8 = scmp.ne.s32.totalorder %s2706_s29, %s2707_s16  ;;  %p2714_p11 = scmp.lt.s32.totalorder %s2712_s8, %s2707_s16 }
  0x54   : > { %p2710_p10 = pnand %p2708_p8, %p2679_p9  ;;  %p2715_p2 = por %p2714_p11, %p2713_p5 }
  0x56   : > { %p2711_p12 = pneg %p2710_p10 }
  0x58   : > { %p2716_p4 = pnand %p2715_p2, %p2711_p12 }
  0x5a   : > { %2719 = shalt.err (!%p2716_p4)
}
  0x5b   : > { %2397 = dma.hbm_to_vmem [thread:$0]  (!%p3043_p7), %s654_s28, 128, %s656_s24, %s644_s1  }
  0x5c   : > { %664 = sbr.rel (%p2966_p3) target bundleno = 4655 (0x122f), region = 100  ;;  %s3078_s23 = sand.u32 (!%p2966_p3), 1, %s2809_s22  }
  0x5d   : > { %s3081_s30 = sshll.u32 (!%p2966_p3), %s3078_s23, 3  ;;  %s667_s3 = scalar_lea.sflag (!%p2966_p3), [#allocation3], %s3078_s23 }
  0x5e   : > { %s670_s4 = scalar_lea.vmem (!%p2966_p3), [#allocation2], %s3081_s30 }
  0x61   : > { %2780 = dma.done.wait (%p3023_p13), %s667_s3, 128  }
  0x62   : > { %2782 = vsyncadd (%p3023_p13), %s667_s3, 4294967168  ;;  %s676_s1 = sand.u32 1, %s2961_s26   ;;  %s680_s27 = scalar_lea.vmem [#allocation5], %s3081_s30 }
  0x63   : > { %s677_s24 = scalar_lea.sflag [#allocation6], %s676_s1 }
  0x64   : > { %2784 = dma.done.wait (%p3023_p13), %s677_s24, 128  }
  0x65   : > { %2786 = vsyncadd (%p3023_p13), %s677_s24, 4294967168 }
  0x66   : > { %2788 = dma.done.wait (%p62_p1), [#allocation6], 32  }
  0x67   : > { %2790 = vsyncadd (%p62_p1), [#allocation6], 4294967264 }
  0x68   : > { %2792 = dma.done.wait (%p62_p1), [#allocation9], 2048  }
  0x69   : > { %2794 = vsyncadd (%p62_p1), [#allocation9], 4294965248 }
  0x6a   : > { %2796 = dma.done.wait (%p62_p1), [#allocation12], 64  }
  0x6b   : > { %2798 = vsyncadd (%p62_p1), [#allocation12], 4294967232  ;;  %s3514_s20 = sld [smem:[#allocation30_spill]]  ;;  %v3113_v2 = vld [vmem:[%s670_s4] sm:$0xff]  ;;  %v3115_v3 = vld [vmem:[%s680_s27] sm:$0xff]  ;;  %vm779_vm0 = vcmask 261120  }
  0x6c   : > { %s3515_s18 = sld [smem:[#allocation29_spill]]  ;;  %v770_v9 = vadd.f32 %v3115_v3, %v3113_v2  ;;  %v2459_v11 = vld [vmem:[%s3450_s6] ss:$0 sm:$0xff]  ;;  %vm866_vm1 = vcmask 64512   ;;  %s2828_s0 = smov 112   ;;  %v862_v37 = vld [vmem:[#allocation8] sm:$0xff] }
  0x6d   : > { %v2460_v12 = vld [vmem:[%s3449_s5] ss:$0 sm:$0xff]  ;;  %s2829_s29 = smov 120   ;;  %s2830_s16 = smov 104  }
  0x6e   : > { %s3516_s14 = sld [smem:[#allocation31_spill]]  ;;  %v2461_v34 = vld [vmem:[#allocation7] ss:$0 sm:$0xff] }
  0x6f   : > { %s3517_s7 = sld [smem:[#allocation35_spill]] }
  0x70   : > { %s3518_s8 = sld [smem:[#allocation37_spill]] }
  0x71   : > { %v806_v0 = vld [vmem:[%s3514_s20 + $0x18] sm:$0xff]  ;;  %v805_v1 = vld [vmem:[%s3514_s20 + $0x10] sm:$0xff]  ;;  %v804_v4 = vld [vmem:[%s3514_s20 + $0x8] sm:$0xff]  ;;  %s3519_s24 = sld [smem:[#allocation39_spill]] }
  0x72   : > { %823 = vmatpush.msra.mxu2 %v806_v0  ;;  %v774_v5 = vld [vmem:[%s3515_s18 + $0x18] sm:$0xff]  ;;  %v773_v6 = vld [vmem:[%s3515_s18 + $0x10] sm:$0xff]  ;;  %v803_v7 = vld [vmem:[%s3514_s20] sm:$0xff]  ;;  %s3520_s17 = sld [smem:[#allocation41_spill]] }
  0x73   : > { %795 = vmatpush.msra.mxu0 %v774_v5  ;;  %v772_v8 = vld [vmem:[%s3515_s18 + $0x8] sm:$0xff]  ;;  %v771_v10 = vld [vmem:[%s3515_s18] sm:$0xff]  ;;  %s3521_s3 = sld [smem:[#allocation40_spill]] }
  0x74   : > { %824 = vmatpush.msra.mxu2 %v805_v1  ;;  %v834_v22 = vld [vmem:[%s3516_s14 + $0x18] sm:$0xff]  ;;  %v833_v23 = vld [vmem:[%s3516_s14 + $0x10] sm:$0xff]  ;;  %v832_v24 = vld [vmem:[%s3516_s14 + $0x8] sm:$0xff] }
  0x75   : > { %796 = vmatpush.msra.mxu0 %v773_v6  ;;  %v831_v25 = vld [vmem:[%s3516_s14] sm:$0xff] }
  0x76   : > { %825 = vmatpush.msra.mxu2 %v804_v4 }
  0x77   : > { %797 = vmatpush.msra.mxu0 %v772_v8 }
  0x78   : > { %826 = vmatpush.msra.mxu2 %v803_v7 }
  0x79   : > { %2277 = vmatmul.msk.f32.vlgmr.msra.gmra.mxu2 %vm779_vm0, %v770_v9  ;;  %798 = vmatpush.msra.mxu0 %v771_v10 }
  0x7a   : > { %2276 = vmatmul.msk.f32.vlgmr.msra.gmra.mxu0 %vm779_vm0, %v770_v9  ;;  %854 = vmatpush.msrb.mxu2 %v834_v22 }
  0x7c   : > { %855 = vmatpush.msrb.mxu2 %v833_v23 }
  0x7e   : > { %856 = vmatpush.msrb.mxu2 %v832_v24 }
  0x80   : > { %857 = vmatpush.msrb.mxu2 %v831_v25 }
  0x81   : > { %2278 = vmatmul.msk.f32.vlgmr.msrb.gmra.mxu2 %vm779_vm0, %v3113_v2 }
  0xf7   : > { %v800_v14 = vpop.f32.mrf.mxu0 }
  0xf8   : > { %v801_v16 = vadd.f32 %v2460_v12, %v800_v14 }
  0xfc   : > { %v828_v13 = vpop.f32.mrf.mxu2 }
  0xfd   : > { %v829_v15 = vadd.f32 %v2459_v11, %v828_v13 }
  0xff   : > { %1067 = vrot.lane.b32.xlu2 %v829_v15, %s2828_s0  ;;  %942 = vrot.lane.b32.xlu1 %v829_v15, %s2829_s29 }
 0x100   : > { %2279 = vmatpush.xpose.msk.msra.mxu3 %vm866_vm1, %v829_v15 }
 0x103   : > { %2280 = vmatmul.msk.f32.vlgmr.msra.gmra.mxu3 %vm866_vm1, %v801_v16 }
 0x104   : > { %v859_v35 = vpop.f32.mrf.mxu2 }
 0x105   : > { %v3173_v36 = vadd.f32 %v2461_v34, %v859_v35 }
 0x107   : > { %1169 = vrot.lane.b32.xlu2 %v829_v15, %s2830_s16  ;;  %940 = vrot.lane.b32.xlu1 %v801_v16, %s2829_s29 }
 0x108   : > { %935 = vmatpush.msrb.mxu3 %v3173_v36 }
 0x10a   : > { %1060 = vmatpush.msra.mxu3 %v862_v37 }
 0x10f   : > { %1167 = vrot.lane.b32.xlu1 %v801_v16, %s2830_s16 }
 0x159   : > { %v1068_v18 = vpop.permute.xlu2 %1067 }
 0x161   : > { %v1170_v33 = vpop.permute.xlu2 %1169 }
 0x171   : > { %v943_v17 = vpop.permute.xlu1 %942 }
 0x172   : > { %2282 = vmatpush.xpose.msk.msrb.mxu0 %vm866_vm1, %v943_v17 }
 0x176   : > { %2287 = vmatpush.xpose.msk.msra.mxu0 %vm866_vm1, %v1068_v18 }
 0x179   : > { %v941_v19 = vpop.permute.xlu1 %940 }
 0x17a   : > { %2283 = vmatmul.msk.f32.vlgmr.msrb.gmra.mxu0 %vm866_vm1, %v941_v19 }
 0x181   : > { %v1168_v59 = vpop.permute.xlu1 %1167 }
 0x186   : > { %v890_v20 = vpop.f32.mrf.mxu3 }
 0x187   : > { %v893_v21 = vsel %vm866_vm1, %v890_v20, -inf }
 0x188   : > { %894 = vmax.xlane.f32.xlu0 %v893_v21 }
 0x1f7   : > { %v965_v26 = vpop.f32.mrf.mxu0 }
 0x1f8   : > { %v968_v27 = vsel %vm866_vm1, %v965_v26, -inf }
 0x1f9   : > { %969 = vmax.xlane.f32.xlu2 %v968_v27 }
 0x1fb   : > { %v895_v28 = vpop.xlane.xlu0 %894 }
 0x1fc   : > { %v896_v29 = vsub.f32 %v890_v20, %v895_v28 }
 0x1fe   : > { %v897_v30 = vmul.f32 1.442695, %v896_v29 }
 0x200   : > { %2481 = vpow2.f32 %v897_v30 }
 0x206   : > { %v2482_v31 = vpop.eup %2481 }
 0x207   : > { %v899_v32 = vsel %vm866_vm1, %v2482_v31, 0.0 }
 0x208   : > { %900 = vadd.xlane.f32.xlu0 %v899_v32 }
 0x21c   : > { %1065 = vrot.lane.b32.xlu0 %v801_v16, %s2828_s0 }
 0x26c   : > { %v970_v38 = vpop.xlane.xlu2 %969 }
 0x26d   : > { %v971_v39 = vsub.f32 %v965_v26, %v970_v38  ;;  %v863_v26 = vld [vmem:[#allocation8 + $0x8] sm:$0xff] }
 0x26e   : > { %1037 = vmatpush.msra.mxu2 %v863_v26  ;;  %v1349_v26 = vld [vmem:[%s3456_s12 + $0x18] sm:$0xff] }
 0x26f   : > { %v972_v40 = vmul.f32 1.442695, %v971_v39 }
 0x271   : > { %2483 = vpow2.f32 %v972_v40 }
 0x277   : > { %v2484_v41 = vpop.eup %2483 }
 0x278   : > { %v974_v42 = vsel %vm866_vm1, %v2484_v41, 0.0 }
 0x279   : > { %975 = vadd.xlane.f32.xlu2 %v974_v42 }
 0x27b   : > { %v901_v43 = vpop.xlane.xlu0 %900 }
 0x27c   : > { %2485 = vrcp.f32 %v901_v43  ;;  %v913_v47 = vand.u32 2147483648, %v901_v43  ;;  %v911_v49 = vand.u32 2147483647, %v901_v43  ;;  %vm907_vm3 = vweird.f32 %v901_v43 }
 0x27e   : > { %v914_v51 = vor.u32 1.1754944e-38, %v913_v47  ;;  %vm912_vm5 = vcmp.eq.f32.partialorder %v911_v49, 8.507059e+37 }
 0x282   : > { %v2486_v44 = vpop.eup %2485 }
 0x283   : > { %v903_v45 = vmul.f32 %v2486_v44, %v901_v43  ;;  %vm908_vm2 = vweird.f32 %v2486_v44 }
 0x284   : > { %vm909_vm4 = vmor %vm907_vm3, %vm908_vm2 }
 0x285   : > { %v904_v46 = vsub.f32 1.0, %v903_v45 }
 0x287   : > { %v905_v48 = vmul.f32 %v2486_v44, %v904_v46 }
 0x289   : > { %v906_v50 = vadd.f32 %v2486_v44, %v905_v48 }
 0x28b   : > { %v910_v52 = vsel %vm909_vm4, %v2486_v44, %v906_v50 }
 0x28c   : > { %v915_v53 = vsel %vm912_vm5, %v914_v51, %v910_v52  ;;  %v865_v52 = vld [vmem:[#allocation8 + $0x18] sm:$0xff] }
 0x28d   : > { %v916_v54 = vmul.f32 %v2482_v31, %v915_v53  ;;  %v864_v53 = vld [vmem:[#allocation8 + $0x10] sm:$0xff] }
 0x28e   : > { %v1066_v55 = vpop.permute.xlu0 %1065  ;;  %1161 = vmatpush.msrb.mxu2 %v864_v53 }
 0x28f   : > { %2281 = vmatmul.msk.f32.vlgmr.msrb.gmra.mxu3 %vm866_vm1, %v916_v54  ;;  %2288 = vmatmul.msk.f32.vlgmr.msra.gmra.mxu0 %vm866_vm1, %v1066_v55 }
 0x290   : > { %2291 = vmatpush.xpose.msk.msrb.mxu3 %vm866_vm1, %v1170_v33 }
 0x2ec   : > { %v976_v6 = vpop.xlane.xlu2 %975 }
 0x2ed   : > { %v988_v12 = vand.u32 2147483648, %v976_v6  ;;  %vm982_vm7 = vweird.f32 %v976_v6  ;;  %v986_v14 = vand.u32 2147483647, %v976_v6 }
 0x2ef   : > { %v989_v16 = vor.u32 1.1754944e-38, %v988_v12  ;;  %vm987_vm9 = vcmp.eq.f32.partialorder %v986_v14, 8.507059e+37 }
 0x30c   : > { %v1090_v56 = vpop.f32.mrf.mxu0 }
 0x30d   : > { %v1093_v57 = vsel %vm866_vm1, %v1090_v56, -inf }
 0x30e   : > { %1094 = vmax.xlane.f32.xlu1 %v1093_v57 }
 0x312   : > { %v937_v58 = vpop.f32.mrf.mxu3 }
 0x313   : > { %2286 = vmatmul.msk.f32.vlgmr.msra.gmra.mxu3 %vm866_vm1, %v937_v58 }
 0x31b   : > { %2292 = vmatmul.msk.f32.vlgmr.msrb.gmra.mxu3 %vm866_vm1, %v1168_v59 }
 0x381   : > { %v1095_v60 = vpop.xlane.xlu1 %1094 }
 0x382   : > { %v1096_v61 = vsub.f32 %v1090_v56, %v1095_v60  ;;  %v2462_v60 = vld [vmem:[%s3453_s9] ss:$0 sm:$0xff] }
 0x384   : > { %v1097_v62 = vmul.f32 1.442695, %v1096_v61 }
 0x386   : > { %2487 = vpow2.f32 %v1097_v62 }
 0x387   : > { %2489 = vrcp.f32 %v976_v6 }
 0x38c   : > { %v3183_v63 = vpop.eup %2487 }
 0x38d   : > { %v1099_v0 = vsel %vm866_vm1, %v3183_v63, 0.0  ;;  %v2490_v7 = vpop.eup %2489 }
 0x38e   : > { %1100 = vadd.xlane.f32.xlu2 %v1099_v0  ;;  %v978_v8 = vmul.f32 %v2490_v7, %v976_v6  ;;  %vm983_vm6 = vweird.f32 %v2490_v7 }
 0x38f   : > { %vm984_vm8 = vmor %vm982_vm7, %vm983_vm6 }
 0x390   : > { %v979_v9 = vsub.f32 1.0, %v978_v8 }
 0x392   : > { %v980_v10 = vmul.f32 %v2490_v7, %v979_v9 }
 0x394   : > { %v981_v11 = vadd.f32 %v2490_v7, %v980_v10 }
 0x396   : > { %v3187_v1 = vpop.f32.mrf.mxu3  ;;  %v985_v15 = vsel %vm984_vm8, %v2490_v7, %v981_v11  ;;  %vm1358_vm8 = vcmask 523264  }
 0x397   : > { %v990_v17 = vsel %vm987_vm9, %v989_v16, %v985_v15  ;;  %v1317_v15 = vld [vmem:[#allocation10 + $0x18] sm:$0xff]  ;;  %v1316_v16 = vld [vmem:[#allocation10 + $0x10] sm:$0xff] }
 0x398   : > { %v991_v19 = vmul.f32 %v2484_v41, %v990_v17  ;;  %v1315_v17 = vld [vmem:[#allocation10 + $0x8] sm:$0xff] }
 0x39e   : > { %v1192_v4 = vpop.f32.mrf.mxu3 }
 0x39f   : > { %v1195_v5 = vsel %vm866_vm1, %v1192_v4, -inf }
 0x3a0   : > { %1196 = vmax.xlane.f32.xlu0 %v1195_v5  ;;  %v2831_v5 = vmov 32.0  }
 0x3a6   : > { %993 = vrot.lane.b32.xlu2 %v3173_v36, %s2829_s29 }
 0x3b4   : > { %1219 = vrot.lane.b32.xlu0 %v3173_v36, %s2830_s16 }
 0x401   : > { %v1101_v13 = vpop.xlane.xlu2 %1100 }
 0x402   : > { %v1113_v41 = vand.u32 2147483648, %v1101_v13  ;;  %vm1107_vm14 = vweird.f32 %v1101_v13  ;;  %v1111_v43 = vand.u32 2147483647, %v1101_v13 }
 0x404   : > { %v1114_v48 = vor.u32 1.1754944e-38, %v1113_v41  ;;  %vm1112_vm3 = vcmp.eq.f32.partialorder %v1111_v43, 8.507059e+37  ;;  %v1346_v41 = vld [vmem:[%s3456_s12] sm:$0xff] }
 0x409   : > { %v994_v18 = vpop.permute.xlu2 %993 }
 0x40a   : > { %1014 = vmatpush.msra.mxu1 %v994_v18  ;;  %v1314_v18 = vld [vmem:[#allocation10] sm:$0xff] }
 0x40b   : > { %2284 = vmatmul.msk.f32.vlgmr.msra.gmra.mxu1 %vm866_vm1, %v991_v19  ;;  %v1353_v19 = vld [vmem:[%s3456_s12 + $0x38] sm:$0xff] }
 0x40c   : > { %1370 = vmatpush.msra.mxu3 %v1353_v19 }
 0x413   : > { %v1197_v20 = vpop.xlane.xlu0 %1196 }
 0x414   : > { %v1198_v21 = vsub.f32 %v1192_v4, %v1197_v20  ;;  %v1352_v20 = vld [vmem:[%s3456_s12 + $0x30] sm:$0xff] }
 0x415   : > { %1371 = vmatpush.msra.mxu3 %v1352_v20 }
 0x416   : > { %v1199_v22 = vmul.f32 1.442695, %v1198_v21  ;;  %v1351_v21 = vld [vmem:[%s3456_s12 + $0x28] sm:$0xff] }
 0x417   : > { %1372 = vmatpush.msra.mxu3 %v1351_v21 }
 0x418   : > { %2491 = vpow2.f32 %v1199_v22 }
 0x419   : > { %2493 = vrcp.f32 %v1101_v13 }
 0x41e   : > { %v2492_v23 = vpop.eup %2491 }
 0x41f   : > { %v1201_v24 = vsel %vm866_vm1, %v2492_v23, 0.0  ;;  %v2494_v28 = vpop.eup %2493 }
 0x420   : > { %1202 = vadd.xlane.f32.xlu1 %v1201_v24  ;;  %v1103_v30 = vmul.f32 %v2494_v28, %v1101_v13  ;;  %vm1108_vm11 = vweird.f32 %v2494_v28  ;;  %v1350_v24 = vld [vmem:[%s3456_s12 + $0x20] sm:$0xff] }
 0x421   : > { %vm1109_vm2 = vmor %vm1107_vm14, %vm1108_vm11  ;;  %1373 = vmatpush.msra.mxu3 %v1350_v24 }
 0x422   : > { %v1104_v31 = vsub.f32 1.0, %v1103_v30 }
 0x423   : > { %1374 = vmatpush.msra.mxu3 %v1349_v26 }
 0x424   : > { %v1105_v34 = vmul.f32 %v2494_v28, %v1104_v31 }
 0x426   : > { %v1220_v25 = vpop.permute.xlu0 %1219 }
 0x427   : > { %1240 = vmatpush.msrb.mxu0 %v1220_v25 }
 0x439   : > { %1117 = vrot.lane.b32.xlu1 %v3173_v36, %s2828_s0  ;;  %v1106_v36 = vadd.f32 %v2494_v28, %v1105_v34 }
 0x43b   : > { %v1110_v47 = vsel %vm1109_vm2, %v2494_v28, %v1106_v36  ;;  %v1348_v36 = vld [vmem:[%s3456_s12 + $0x10] sm:$0xff] }
 0x43c   : > { %v1115_v49 = vsel %vm1112_vm3, %v1114_v48, %v1110_v47  ;;  %1375 = vmatpush.msra.mxu3 %v1348_v36  ;;  %v1513_v36 = vld [vmem:[#allocation8 + $0x20] sm:$0xff] }
 0x43d   : > { %v1116_v51 = vmul.f32 %v3183_v63, %v1115_v49 }
 0x488   : > { %v1016_v27 = vpop.f32.mrf.mxu1 }
 0x489   : > { %2285 = vmatmul.msk.f32.vlgmr.msra.gmra.mxu2 %vm866_vm1, %v1016_v27 }
 0x48a   : > { %1337 = vmatpush.msra.mxu2 %v1317_v15  ;;  %v2467_v15 = vld [vmem:[%s3518_s8] ss:$0 sm:$0xff] }
 0x48c   : > { %1338 = vmatpush.msra.mxu2 %v1316_v16 }
 0x48e   : > { %1339 = vmatpush.msra.mxu2 %v1315_v17 }
 0x490   : > { %1340 = vmatpush.msra.mxu2 %v1314_v18  ;;  %v2468_v18 = vld [vmem:[#allocation13] ss:$0 sm:$0xff] }
 0x493   : > { %v1203_v29 = vpop.xlane.xlu1 %1202 }
 0x494   : > { %2495 = vrcp.f32 %v1203_v29  ;;  %v1215_v37 = vand.u32 2147483648, %v1203_v29  ;;  %v1213_v39 = vand.u32 2147483647, %v1203_v29  ;;  %vm1209_vm12 = vweird.f32 %v1203_v29 }
 0x495   : > { %2497 = vrcp.f32 %v2831_v5  ;;  %v2297_v5 = vld [vmem:[%s3515_s18 + $0x20] sm:$0xff] }
 0x496   : > { %v1216_v42 = vor.u32 1.1754944e-38, %v1215_v37  ;;  %vm1214_vm15 = vcmp.eq.f32.partialorder %v1213_v39, 8.507059e+37  ;;  %v2464_v37 = vld [vmem:[%s3459_s15] ss:$0 sm:$0xff] }
 0x49a   : > { %v2496_v32 = vpop.eup %2495 }
 0x49b   : > { %v1205_v33 = vmul.f32 %v2496_v32, %v1203_v29  ;;  %vm1210_vm10 = vweird.f32 %v2496_v32  ;;  %v2498_v6 = vpop.eup %2497 }
 0x49c   : > { %vm1211_vm13 = vmor %vm1209_vm12, %vm1210_vm10  ;;  %v1281_v7 = vmul.f32 32.0, %v2498_v6  ;;  %vm1285_vm4 = vweird.f32 %v2498_v6 }
 0x49d   : > { %v1206_v35 = vsub.f32 1.0, %v1205_v33  ;;  %v2463_v33 = vld [vmem:[#allocation11] ss:$0 sm:$0xff] }
 0x49e   : > { %v1282_v8 = vsub.f32 1.0, %v1281_v7 }
 0x49f   : > { %v1207_v38 = vmul.f32 %v2496_v32, %v1206_v35 }
 0x4a1   : > { %v1208_v40 = vadd.f32 %v2496_v32, %v1207_v38 }
 0x4a3   : > { %v1212_v44 = vsel %vm1211_vm13, %v2496_v32, %v1208_v40  ;;  %v1347_v40 = vld [vmem:[%s3456_s12 + $0x8] sm:$0xff] }
 0x4a4   : > { %v1217_v45 = vsel %vm1214_vm15, %v1216_v42, %v1212_v44  ;;  %1376 = vmatpush.msra.mxu3 %v1347_v40  ;;  %v2465_v42 = vld [vmem:[%s3455_s11] ss:$0 sm:$0xff] }
 0x4a5   : > { %v1218_v46 = vmul.f32 %v2492_v23, %v1217_v45 }
 0x4a6   : > { %1377 = vmatpush.msra.mxu3 %v1346_v41 }
 0x4a7   : > { %2293 = vmatmul.msk.f32.vlgmr.msrb.gmra.mxu0 %vm866_vm1, %v1218_v46  ;;  %v2466_v46 = vld [vmem:[%s3517_s7] ss:$0 sm:$0xff] }
 0x4ab   : > { %v1118_v50 = vpop.permute.xlu1 %1117 }
 0x4ac   : > { %1138 = vmatpush.msrb.mxu1 %v1118_v50 }
 0x4ad   : > { %2289 = vmatmul.msk.f32.vlgmr.msrb.gmra.mxu1 %vm866_vm1, %v1116_v51 }
 0x4ae   : > { %1263 = vmatpush.msra.mxu1 %v865_v52 }
 0x50c   : > { %v1039_v56 = vpop.f32.mrf.mxu2 }
 0x50d   : > { %v1063_v57 = vadd.f32 %v3187_v1, %v1039_v56  ;;  %v1283_v1 = vmul.f32 %v2498_v6, %v1282_v8  ;;  %v2312_v56 = vld [vmem:[%s3516_s14 + $0x38] sm:$0xff] }
 0x50f   : > { %v1284_v9 = vadd.f32 %v2498_v6, %v1283_v1 }
 0x511   : > { %v3210_v10 = vsel %vm1285_vm4, %v2498_v6, %v1284_v9  ;;  %v2303_v6 = vld [vmem:[%s3514_s20 + $0x20] sm:$0xff] }
 0x524   : > { %v1242_v54 = vpop.f32.mrf.mxu0 }
 0x525   : > { %2294 = vmatmul.msk.f32.vlgmr.msra.gmra.mxu1 %vm866_vm1, %v1242_v54 }
 0x52a   : > { %v1140_v55 = vpop.f32.mrf.mxu1 }
 0x52b   : > { %2290 = vmatmul.msk.f32.vlgmr.msrb.gmra.mxu2 %vm866_vm1, %v1140_v55 }
 0x52c   : > { %1504 = vmatpush.msrb.mxu2 %v2312_v56 }
 0x5a2   : > { %v1265_v61 = vpop.f32.mrf.mxu1 }
 0x5ae   : > { %v1163_v58 = vpop.f32.mrf.mxu2 }
 0x5af   : > { %v1166_v59 = vadd.f32 %v1163_v58, %v1063_v57  ;;  %v2300_v57 = vld [vmem:[%s3515_s18 + $0x38] sm:$0xff] }
 0x5b0   : > { %v2306_v58 = vld [vmem:[%s3514_s20 + $0x38] sm:$0xff]  ;;  %1441 = vmatpush.msra.mxu0 %v2300_v57 }
 0x5b1   : > { %v1268_v62 = vadd.f32 %v1265_v61, %v1166_v59  ;;  %v2311_v59 = vld [vmem:[%s3516_s14 + $0x30] sm:$0xff]  ;;  %1471 = vmatpush.msrb.mxu1 %v2306_v58 }
 0x5b2   : > { %v2305_v61 = vld [vmem:[%s3514_s20 + $0x30] sm:$0xff]  ;;  %1505 = vmatpush.msrb.mxu2 %v2311_v59 }
 0x5b3   : > { %v1273_v63 = vadd.f32 %v2462_v60, %v1268_v62  ;;  %v2299_v60 = vld [vmem:[%s3515_s18 + $0x30] sm:$0xff]  ;;  %v2310_v62 = vld [vmem:[%s3516_s14 + $0x28] sm:$0xff]  ;;  %1472 = vmatpush.msrb.mxu1 %v2305_v61 }
 0x5b4   : > { %1442 = vmatpush.msra.mxu0 %v2299_v60  ;;  %1506 = vmatpush.msrb.mxu2 %v2310_v62 }
 0x5b5   : > { %v1274_v0 = vadd.f32 %v1273_v63, %v3113_v2  ;;  %v2298_v63 = vld [vmem:[%s3515_s18 + $0x28] sm:$0xff] }
 0x5b6   : > { %1443 = vmatpush.msra.mxu0 %v2298_v63 }
 0x5b7   : > { %v1277_v4 = vsel %vm779_vm0, %v1274_v0, 0.0 }
 0x5b8   : > { %1278 = vadd.xlane.f32.xlu2 %v1277_v4  ;;  %v2309_v4 = vld [vmem:[%s3516_s14 + $0x20] sm:$0xff]  ;;  %1444 = vmatpush.msra.mxu0 %v2297_v5 }
 0x5b9   : > { %1507 = vmatpush.msrb.mxu2 %v2309_v4 }
 0x62b   : > { %v1279_v11 = vpop.xlane.xlu2 %1278 }
 0x62c   : > { %v1287_v12 = vmul.f32 %v3210_v10, %v1279_v11 }
 0x62e   : > { %v1288_v13 = vsub.f32 %v1274_v0, %v1287_v12  ;;  %v2304_v0 = vld [vmem:[%s3514_s20 + $0x28] sm:$0xff] }
 0x62f   : > { %1473 = vmatpush.msrb.mxu1 %v2304_v0 }
 0x630   : > { %v1289_v14 = vmul.f32 %v1288_v13, %v1288_v13 }
 0x631   : > { %1474 = vmatpush.msrb.mxu1 %v2303_v6 }
 0x632   : > { %v1290_v2 = vsel %vm779_vm0, %v1289_v14, 0.0 }
 0x633   : > { %1291 = vadd.xlane.f32.xlu0 %v1290_v2 }
 0x6a6   : > { %v1292_v22 = vpop.xlane.xlu0 %1291 }
 0x6a7   : > { %v1293_v23 = vmul.f32 %v1292_v22, %v3210_v10  ;;  %v2470_v22 = vld [vmem:[%s3450_s6 + $0x1] ss:$0 sm:$0xff] }
 0x6a9   : > { %v1294_v25 = vadd.f32 1e-05, %v1293_v23  ;;  %v2469_v23 = vld [vmem:[%s3449_s5 + $0x1] ss:$0 sm:$0xff] }
 0x6ab   : > { %2499 = vrsqrt.f32 %v1294_v25  ;;  %vm1301_vm6 = vweird.f32 %v1294_v25 }
 0x6b1   : > { %v2500_v27 = vpop.eup %2499 }
 0x6b2   : > { %v1296_v28 = vmul.f32 %v2500_v27, %v1294_v25  ;;  %vm1302_vm5 = vweird.f32 %v2500_v27 }
 0x6b3   : > { %vm1303_vm7 = vmor %vm1301_vm6, %vm1302_vm5 }
 0x6b4   : > { %v1297_v29 = vmul.f32 %v2500_v27, %v1296_v28 }
 0x6b6   : > { %v1298_v30 = vmul.f32 0.5, %v1297_v29 }
 0x6b8   : > { %v1299_v31 = vsub.f32 1.5, %v1298_v30 }
 0x6ba   : > { %v1300_v32 = vmul.f32 %v2500_v27, %v1299_v31 }
 0x6bc   : > { %v1304_v34 = vsel %vm1303_vm7, %v2500_v27, %v1300_v32  ;;  %v2471_v27 = vld [vmem:[#allocation7 + $0x1] ss:$0 sm:$0xff] }
 0x6bd   : > { %v1305_v35 = vmul.f32 %v1304_v34, %v1288_v13 }
 0x6bf   : > { %v1309_v38 = vmul.f32 %v2463_v33, %v1305_v35 }
 0x6c1   : > { %v1313_v39 = vadd.f32 %v2464_v37, %v1309_v38 }
 0x6c3   : > { %2295 = vmatmul.msk.f32.vlgmr.msra.gmra.mxu2 %vm779_vm0, %v1313_v39 }
 0x746   : > { %v1342_v43 = vpop.f32.mrf.mxu2 }
 0x747   : > { %v1343_v44 = vadd.f32 %v2465_v42, %v1342_v43 }
 0x749   : > { %v1345_v45 = vmax.f32 %v1343_v44, 0.0 }
 0x74b   : > { %2296 = vmatmul.msk.f32.vlgmr.msra.gmra.mxu3 %vm1358_vm8, %v1345_v45 }
 0x7ce   : > { %v1379_v47 = vpop.f32.mrf.mxu3 }
 0x7cf   : > { %v1380_v48 = vadd.f32 %v2466_v46, %v1379_v47 }
 0x7d1   : > { %v1382_v49 = vadd.f32 %v1380_v48, %v1313_v39 }
 0x7d3   : > { %v1385_v50 = vsel %vm779_vm0, %v1382_v49, 0.0 }
 0x7d4   : > { %1386 = vadd.xlane.f32.xlu1 %v1385_v50 }
 0x847   : > { %v1387_v51 = vpop.xlane.xlu1 %1386 }
 0x848   : > { %v1388_v52 = vmul.f32 %v1387_v51, %v3210_v10 }
 0x84a   : > { %v1389_v53 = vsub.f32 %v1382_v49, %v1388_v52 }
 0x84c   : > { %v1390_v54 = vmul.f32 %v1389_v53, %v1389_v53 }
 0x84e   : > { %v1391_v55 = vsel %vm779_vm0, %v1390_v54, 0.0 }
 0x84f   : > { %1392 = vadd.xlane.f32.xlu2 %v1391_v55 }
 0x8c2   : > { %v1393_v7 = vpop.xlane.xlu2 %1392 }
 0x8c3   : > { %v1394_v8 = vmul.f32 %v1393_v7, %v3210_v10 }
 0x8c5   : > { %v1395_v1 = vadd.f32 1e-05, %v1394_v8 }
 0x8c7   : > { %2501 = vrsqrt.f32 %v1395_v1  ;;  %vm1402_vm10 = vweird.f32 %v1395_v1 }
 0x8cd   : > { %v2502_v9 = vpop.eup %2501 }
 0x8ce   : > { %v1397_v11 = vmul.f32 %v2502_v9, %v1395_v1  ;;  %vm1403_vm9 = vweird.f32 %v2502_v9 }
 0x8cf   : > { %vm1404_vm11 = vmor %vm1402_vm10, %vm1403_vm9 }
 0x8d0   : > { %v1398_v12 = vmul.f32 %v2502_v9, %v1397_v11 }
 0x8d2   : > { %v1399_v13 = vmul.f32 0.5, %v1398_v12 }
 0x8d4   : > { %v1400_v14 = vsub.f32 1.5, %v1399_v13 }
 0x8d6   : > { %v1401_v2 = vmul.f32 %v2502_v9, %v1400_v14 }
 0x8d8   : > { %v1405_v16 = vsel %vm1404_vm11, %v2502_v9, %v1401_v2 }
 0x8d9   : > { %v1406_v17 = vmul.f32 %v1405_v16, %v1389_v53 }
 0x8db   : > { %v1410_v19 = vmul.f32 %v2467_v15, %v1406_v17 }
 0x8dd   : > { %v3293_v20 = vadd.f32 %v2468_v18, %v1410_v19 }
 0x8df   : > { %2313 = vmatmul.msk.f32.vlgmr.msrb.gmra.mxu2 %vm779_vm0, %v3293_v20  ;;  %v1415_v21 = vadd.f32 %v3293_v20, %v3115_v3 }
 0x8e1   : > { %2302 = vmatmul.msk.f32.vlgmr.msra.gmra.mxu0 %vm779_vm0, %v1415_v21  ;;  %2308 = vmatmul.msk.f32.vlgmr.msrb.gmra.mxu1 %vm779_vm0, %v1415_v21 }
 0x95e   : > { %v1476_v24 = vpop.f32.mrf.mxu1  ;;  %v1446_v25 = vpop.f32.mrf.mxu0 }
 0x95f   : > { %v1477_v26 = vadd.f32 %v2470_v22, %v1476_v24  ;;  %v1447_v3 = vadd.f32 %v2469_v23, %v1446_v25 }
 0x961   : > { %1592 = vrot.lane.b32.xlu2 %v1477_v26, %s2829_s29  ;;  %2314 = vmatpush.xpose.msk.msrb.mxu0 %vm866_vm1, %v1477_v26 }
 0x962   : > { %v1509_v28 = vpop.f32.mrf.mxu2 }
 0x963   : > { %v3309_v29 = vadd.f32 %v2471_v27, %v1509_v28 }
 0x964   : > { %2315 = vmatmul.msk.f32.vlgmr.msrb.gmra.mxu0 %vm866_vm1, %v1447_v3 }
 0x965   : > { %1585 = vmatpush.msra.mxu1 %v3309_v29 }
 0x967   : > { %1710 = vmatpush.msrb.mxu1 %v1513_v36 }
 0x969   : > { %1715 = vrot.lane.b32.xlu2 %v1447_v3, %s2828_s0 }
 0x9bb   : > { %v1593_v30 = vpop.permute.xlu2 %1592 }
 0x9bc   : > { %2317 = vmatpush.xpose.msk.msra.mxu2 %vm866_vm1, %v1593_v30 }
 0x9c3   : > { %v1716_v56 = vpop.permute.xlu2 %1715 }
 0x9e1   : > { %v1540_v31 = vpop.f32.mrf.mxu0 }
 0x9e2   : > { %v1543_v32 = vsel %vm866_vm1, %v1540_v31, -inf }
 0x9e3   : > { %1544 = vmax.xlane.f32.xlu0 %v1543_v32 }
 0x9f7   : > { %1590 = vrot.lane.b32.xlu0 %v1447_v3, %s2829_s29 }
 0x9ff   : > { %1819 = vrot.lane.b32.xlu0 %v1477_v26, %s2830_s16 }
 0xa56   : > { %v1545_v33 = vpop.xlane.xlu0 %1544 }
 0xa57   : > { %v1546_v34 = vsub.f32 %v1540_v31, %v1545_v33 }
 0xa59   : > { %v1547_v35 = vmul.f32 1.442695, %v1546_v34 }
 0xa5b   : > { %2503 = vpow2.f32 %v1547_v35 }
 0xa61   : > { %v2504_v37 = vpop.eup %2503 }
 0xa62   : > { %v1549_v38 = vsel %vm866_vm1, %v2504_v37, 0.0 }
 0xa63   : > { %1550 = vadd.xlane.f32.xlu1 %v1549_v38 }
 0xa69   : > { %v1591_v39 = vpop.permute.xlu0 %1590 }
 0xa6a   : > { %2318 = vmatmul.msk.f32.vlgmr.msra.gmra.mxu2 %vm866_vm1, %v1591_v39 }
 0xa71   : > { %v1820_v52 = vpop.permute.xlu0 %1819 }
 0xa7c   : > { %1717 = vrot.lane.b32.xlu1 %v1477_v26, %s2828_s0  ;;  %v1514_v26 = vld [vmem:[#allocation8 + $0x28] sm:$0xff] }
 0xa7d   : > { %1687 = vmatpush.msra.mxu0 %v1514_v26  ;;  %v2337_v26 = vld [vmem:[%s3456_s12 + $0x58] sm:$0xff] }
 0xa84   : > { %1817 = vrot.lane.b32.xlu1 %v1447_v3, %s2830_s16 }
 0xad6   : > { %v1551_v40 = vpop.xlane.xlu1 %1550 }
 0xad7   : > { %2505 = vrcp.f32 %v1551_v40  ;;  %v1563_v44 = vand.u32 2147483648, %v1551_v40  ;;  %v1561_v46 = vand.u32 2147483647, %v1551_v40  ;;  %vm1557_vm13 = vweird.f32 %v1551_v40 }
 0xad9   : > { %v1564_v48 = vor.u32 1.1754944e-38, %v1563_v44  ;;  %vm1562_vm15 = vcmp.eq.f32.partialorder %v1561_v46, 8.507059e+37 }
 0xadd   : > { %v2506_v41 = vpop.eup %2505 }
 0xade   : > { %v1553_v42 = vmul.f32 %v2506_v41, %v1551_v40  ;;  %vm1558_vm12 = vweird.f32 %v2506_v41 }
 0xadf   : > { %vm1559_vm14 = vmor %vm1557_vm13, %vm1558_vm12 }
 0xae0   : > { %v1554_v43 = vsub.f32 1.0, %v1553_v42 }
 0xae2   : > { %v1555_v45 = vmul.f32 %v2506_v41, %v1554_v43 }
 0xae4   : > { %v1556_v47 = vadd.f32 %v2506_v41, %v1555_v45 }
 0xae6   : > { %v1560_v49 = vsel %vm1559_vm14, %v2506_v41, %v1556_v47  ;;  %v1515_v47 = vld [vmem:[#allocation8 + $0x30] sm:$0xff] }
 0xae7   : > { %v1565_v50 = vsel %vm1562_vm15, %v1564_v48, %v1560_v49  ;;  %1811 = vmatpush.msrb.mxu0 %v1515_v47 }
 0xae8   : > { %v1566_v51 = vmul.f32 %v2504_v37, %v1565_v50 }
 0xaea   : > { %2316 = vmatmul.msk.f32.vlgmr.msra.gmra.mxu1 %vm866_vm1, %v1566_v51 }
 0xaeb   : > { %2326 = vmatpush.xpose.msk.msra.mxu1 %vm866_vm1, %v1820_v52 }
 0xaed   : > { %v1615_v53 = vpop.f32.mrf.mxu2 }
 0xaee   : > { %v1718_v54 = vpop.permute.xlu1 %1717  ;;  %v1618_v55 = vsel %vm866_vm1, %v1615_v53, -inf }
 0xaef   : > { %2322 = vmatpush.xpose.msk.msrb.mxu2 %vm866_vm1, %v1718_v54  ;;  %1619 = vmax.xlane.f32.xlu0 %v1618_v55 }
 0xaf2   : > { %2323 = vmatmul.msk.f32.vlgmr.msrb.gmra.mxu2 %vm866_vm1, %v1716_v56 }
 0xaf6   : > { %v1818_v63 = vpop.permute.xlu1 %1817 }
 0xb62   : > { %v1620_v57 = vpop.xlane.xlu0 %1619 }
 0xb63   : > { %v1621_v58 = vsub.f32 %v1615_v53, %v1620_v57 }
 0xb65   : > { %v1622_v59 = vmul.f32 1.442695, %v1621_v58 }
 0xb67   : > { %2507 = vpow2.f32 %v1622_v59  ;;  %v1587_v60 = vpop.f32.mrf.mxu1 }
 0xb68   : > { %2321 = vmatmul.msk.f32.vlgmr.msrb.gmra.mxu1 %vm866_vm1, %v1587_v60  ;;  %v1516_v60 = vld [vmem:[#allocation8 + $0x38] sm:$0xff] }
 0xb6d   : > { %v2508_v61 = vpop.eup %2507 }
 0xb6e   : > { %v1624_v62 = vsel %vm866_vm1, %v2508_v61, 0.0 }
 0xb6f   : > { %1625 = vadd.xlane.f32.xlu0 %v1624_v62 }
 0xb70   : > { %2327 = vmatmul.msk.f32.vlgmr.msra.gmra.mxu1 %vm866_vm1, %v1818_v63 }
 0xb75   : > { %v1740_v0 = vpop.f32.mrf.mxu2 }
 0xb76   : > { %v1743_v4 = vsel %vm866_vm1, %v1740_v0, -inf }
 0xb77   : > { %1744 = vmax.xlane.f32.xlu1 %v1743_v4 }
 0xb83   : > { %1643 = vrot.lane.b32.xlu0 %v3309_v29, %s2829_s29  ;;  %s2100_s29 = scalar_lea.sflag [#allocation4], %s3078_s23 }
 0xbe2   : > { %v1626_v5 = vpop.xlane.xlu0 %1625 }
 0xbe3   : > { %2509 = vrcp.f32 %v1626_v5  ;;  %v1638_v12 = vand.u32 2147483648, %v1626_v5  ;;  %v1636_v15 = vand.u32 2147483647, %v1626_v5  ;;  %vm1632_vm3 = vweird.f32 %v1626_v5 }
 0xbe5   : > { %v3333_v6 = vpop.f32.mrf.mxu1  ;;  %v1639_v18 = vor.u32 1.1754944e-38, %v1638_v12  ;;  %vm1637_vm5 = vcmp.eq.f32.partialorder %v1636_v15, 8.507059e+37  ;;  %v1964_v15 = vld [vmem:[#allocation10 + $0x38] sm:$0xff] }
 0xbe9   : > { %v2510_v7 = vpop.eup %2509 }
 0xbea   : > { %v1628_v8 = vmul.f32 %v2510_v7, %v1626_v5  ;;  %v1745_v1 = vpop.xlane.xlu1 %1744  ;;  %vm1633_vm2 = vweird.f32 %v2510_v7  ;;  %v2472_v5 = vld [vmem:[%s3453_s9 + $0x1] ss:$0 sm:$0xff] }
 0xbeb   : > { %v1746_v9 = vsub.f32 %v1740_v0, %v1745_v1  ;;  %vm1634_vm4 = vmor %vm1632_vm3, %vm1633_vm2 }
 0xbec   : > { %v1629_v11 = vsub.f32 1.0, %v1628_v8 }
 0xbed   : > { %v1747_v13 = vmul.f32 1.442695, %v1746_v9  ;;  %v1842_v14 = vpop.f32.mrf.mxu1 }
 0xbee   : > { %v1630_v2 = vmul.f32 %v2510_v7, %v1629_v11  ;;  %v1845_v16 = vsel %vm866_vm1, %v1842_v14, -inf }
 0xbef   : > { %2511 = vpow2.f32 %v1747_v13  ;;  %1846 = vmax.xlane.f32.xlu2 %v1845_v16  ;;  %v1963_v16 = vld [vmem:[#allocation10 + $0x30] sm:$0xff] }
 0xbf0   : > { %v1631_v17 = vadd.f32 %v2510_v7, %v1630_v2 }
 0xbf2   : > { %v1635_v19 = vsel %vm1634_vm4, %v2510_v7, %v1631_v17  ;;  %v1962_v17 = vld [vmem:[#allocation10 + $0x28] sm:$0xff] }
 0xbf3   : > { %v1640_v21 = vsel %vm1637_vm5, %v1639_v18, %v1635_v19  ;;  %v1961_v18 = vld [vmem:[#allocation10 + $0x20] sm:$0xff]  ;;  %v2340_v19 = vld [vmem:[%s3456_s12 + $0x70] sm:$0xff] }
 0xbf4   : > { %v1641_v22 = vmul.f32 %v2508_v61, %v1640_v21  ;;  %v2339_v21 = vld [vmem:[%s3456_s12 + $0x68] sm:$0xff] }
 0xbf5   : > { %v2512_v23 = vpop.eup %2511  ;;  %v1644_v24 = vpop.permute.xlu0 %1643 }
 0xbf6   : > { %1664 = vmatpush.msrb.mxu3 %v1644_v24  ;;  %v1749_v25 = vsel %vm866_vm1, %v2512_v23, 0.0  ;;  %v2338_v24 = vld [vmem:[%s3456_s12 + $0x60] sm:$0xff] }
 0xbf7   : > { %1750 = vadd.xlane.f32.xlu1 %v1749_v25  ;;  %2319 = vmatmul.msk.f32.vlgmr.msrb.gmra.mxu3 %vm866_vm1, %v1641_v22 }
 0xc10   : > { %1767 = vrot.lane.b32.xlu1 %v3309_v29, %s2828_s0  ;;  %s2346_s0 = sshll.u32 %s2961_s26, 3  ;;  %s767_s26 = scalar_lea.vmem [#allocation14], %s3081_s30 }
 0xc11   : > { %s2110_s28 = scalar_lea.hbm %s3520_s17, %s2346_s0  ;;  %s2112_s4 = sshll.u32 %s767_s26, 4  ;;  %s2113_s4 = int_to_ptr.vmem [resolvable:$true] %s2112_s4 }
 0xc12   : > { %s2114_s1 = sshll.u32 %s2110_s28, 4  ;;  %s2755_s30 = scalar_lea.hbm %s3520_s17, 16  ;;  %s2115_s1 = int_to_ptr.hbm [resolvable:$true] %s2114_s1 }
 0xc62   : > { %v1847_v27 = vpop.xlane.xlu2 %1846 }
 0xc63   : > { %v1848_v3 = vsub.f32 %v1842_v14, %v1847_v27 }
 0xc65   : > { %v1849_v28 = vmul.f32 1.442695, %v1848_v3 }
 0xc67   : > { %2513 = vpow2.f32 %v1849_v28 }
 0xc6a   : > { %v1751_v30 = vpop.xlane.xlu1 %1750 }
 0xc6b   : > { %2515 = vrcp.f32 %v1751_v30  ;;  %v1763_v39 = vand.u32 2147483648, %v1751_v30  ;;  %vm1757_vm7 = vweird.f32 %v1751_v30  ;;  %v1761_v36 = vand.u32 2147483647, %v1751_v30 }
 0xc6d   : > { %v2514_v31 = vpop.eup %2513  ;;  %v1764_v42 = vor.u32 1.1754944e-38, %v1763_v39  ;;  %vm1762_vm10 = vcmp.eq.f32.partialorder %v1761_v36, 8.507059e+37  ;;  %v2336_v36 = vld [vmem:[%s3456_s12 + $0x50] sm:$0xff] }
 0xc6e   : > { %v1851_v32 = vsel %vm866_vm1, %v2514_v31, 0.0 }
 0xc6f   : > { %1852 = vadd.xlane.f32.xlu2 %v1851_v32 }
 0xc71   : > { %v2516_v33 = vpop.eup %2515 }
 0xc72   : > { %v1753_v34 = vmul.f32 %v2516_v33, %v1751_v30  ;;  %vm1758_vm6 = vweird.f32 %v2516_v33 }
 0xc73   : > { %vm1759_vm9 = vmor %vm1757_vm7, %vm1758_vm6 }
 0xc74   : > { %v1754_v35 = vsub.f32 1.0, %v1753_v34 }
 0xc76   : > { %v1755_v37 = vmul.f32 %v2516_v33, %v1754_v35 }
 0xc78   : > { %v1756_v38 = vadd.f32 %v2516_v33, %v1755_v37  ;;  %v2474_v37 = vld [vmem:[%s3459_s15 + $0x1] ss:$0 sm:$0xff] }
 0xc7a   : > { %v1666_v40 = vpop.f32.mrf.mxu3  ;;  %v1760_v41 = vsel %vm1759_vm9, %v2516_v33, %v1756_v38  ;;  %v2473_v33 = vld [vmem:[#allocation11 + $0x1] ss:$0 sm:$0xff] }
 0xc7b   : > { %2320 = vmatmul.msk.f32.vlgmr.msra.gmra.mxu0 %vm866_vm1, %v1666_v40  ;;  %v1765_v43 = vsel %vm1762_vm10, %v1764_v42, %v1760_v41  ;;  %v2335_v40 = vld [vmem:[%s3456_s12 + $0x48] sm:$0xff]  ;;  %v2334_v41 = vld [vmem:[%s3456_s12 + $0x40] sm:$0xff] }
 0xc7c   : > { %v1766_v45 = vmul.f32 %v2512_v23, %v1765_v43  ;;  %1985 = vmatpush.msra.mxu0 %v1964_v15  ;;  %v2475_v42 = vld [vmem:[%s3455_s11 + $0x1] ss:$0 sm:$0xff] }
 0xc7e   : > { %1986 = vmatpush.msra.mxu0 %v1963_v16 }
 0xc80   : > { %1987 = vmatpush.msra.mxu0 %v1962_v17 }
 0xc82   : > { %v1768_v44 = vpop.permute.xlu1 %1767  ;;  %1988 = vmatpush.msra.mxu0 %v1961_v18 }
 0xc83   : > { %1788 = vmatpush.msra.mxu3 %v1768_v44 }
 0xc84   : > { %2324 = vmatmul.msk.f32.vlgmr.msra.gmra.mxu3 %vm866_vm1, %v1766_v45 }
 0xc85   : > { %1913 = vmatpush.msrb.mxu3 %v1516_v60 }
 0xc87   : > { %1869 = vrot.lane.b32.xlu2 %v3309_v29, %s2830_s16  ;;  %s2749_s16 = sshra.s32 %s2115_s1, 4  ;;  %s2750_s16 = int_to_ptr.hbm [resolvable:$true] %s2749_s16 }
 0xc88   : > { %s2751_s0 = scalar_lea.hbm %s2750_s16, 8  ;;  %p2756_p7 = scmp.lt.s32.totalorder %s2750_s16, %s3520_s17 }
 0xc89   : > { %p2752_p1 = scmp.ne.s32.totalorder %s2750_s16, %s2751_s0  ;;  %p2757_p9 = scmp.lt.s32.totalorder %s2755_s30, %s2751_s0 }
 0xc8b   : > { %p2753_p3 = pnand %p2752_p1, %p3027_p0  ;;  %p2758_p8 = por %p2757_p9, %p2756_p7 }
 0xc8d   : > { %p2754_p13 = pneg %p2753_p3 }
 0xc8f   : > { %p2759_p10 = pnand %p2758_p8, %p2754_p13 }
 0xce2   : > { %v1853_v46 = vpop.xlane.xlu2 %1852 }
 0xce3   : > { %2517 = vrcp.f32 %v1853_v46  ;;  %v1865_v52 = vand.u32 2147483648, %v1853_v46  ;;  %v1863_v54 = vand.u32 2147483647, %v1853_v46  ;;  %vm1859_vm12 = vweird.f32 %v1853_v46 }
 0xce5   : > { %v1866_v56 = vor.u32 1.1754944e-38, %v1865_v52  ;;  %vm1864_vm14 = vcmp.eq.f32.partialorder %v1863_v54, 8.507059e+37 }
 0xce9   : > { %v2518_v48 = vpop.eup %2517 }
 0xcea   : > { %v1855_v49 = vmul.f32 %v2518_v48, %v1853_v46  ;;  %v1870_v50 = vpop.permute.xlu2 %1869  ;;  %vm1860_vm11 = vweird.f32 %v2518_v48  ;;  %v2476_v46 = vld [vmem:[%s3517_s7 + $0x1] ss:$0 sm:$0xff] }
 0xceb   : > { %1890 = vmatpush.msra.mxu2 %v1870_v50  ;;  %vm1861_vm13 = vmor %vm1859_vm12, %vm1860_vm11 }
 0xcec   : > { %v1856_v51 = vsub.f32 1.0, %v1855_v49 }
 0xcee   : > { %v1857_v53 = vmul.f32 %v2518_v48, %v1856_v51 }
 0xcf0   : > { %v1858_v55 = vadd.f32 %v2518_v48, %v1857_v53 }
 0xcf2   : > { %v1862_v57 = vsel %vm1861_vm13, %v2518_v48, %v1858_v55 }
 0xcf3   : > { %v1867_v29 = vsel %vm1864_vm14, %v1866_v56, %v1862_v57 }
 0xcf4   : > { %v1868_v58 = vmul.f32 %v2514_v31, %v1867_v29 }
 0xcf6   : > { %2328 = vmatmul.msk.f32.vlgmr.msra.gmra.mxu2 %vm866_vm1, %v1868_v58 }
 0xcf8   : > { %v1689_v62 = vpop.f32.mrf.mxu0 }
 0xcf9   : > { %v1713_v0 = vadd.f32 %v3333_v6, %v1689_v62 }
 0xd07   : > { %v1790_v59 = vpop.f32.mrf.mxu3 }
 0xd08   : > { %2325 = vmatmul.msk.f32.vlgmr.msrb.gmra.mxu0 %vm866_vm1, %v1790_v59 }
 0xd79   : > { %v1892_v61 = vpop.f32.mrf.mxu2 }
 0xd7a   : > { %2329 = vmatmul.msk.f32.vlgmr.msrb.gmra.mxu3 %vm866_vm1, %v1892_v61 }
 0xd85   : > { %v1813_v63 = vpop.f32.mrf.mxu0 }
 0xd86   : > { %v1816_v4 = vadd.f32 %v1813_v63, %v1713_v0  ;;  %v2477_v0 = vld [vmem:[%s3518_s8 + $0x1] ss:$0 sm:$0xff] }
 0xdfd   : > { %v1915_v7 = vpop.f32.mrf.mxu3 }
 0xdfe   : > { %v1918_v8 = vadd.f32 %v1915_v7, %v1816_v4  ;;  %v2478_v7 = vld [vmem:[#allocation13 + $0x1] ss:$0 sm:$0xff] }
 0xe00   : > { %v1924_v1 = vadd.f32 %v2472_v5, %v1918_v8 }
 0xe02   : > { %v1925_v9 = vadd.f32 %v1924_v1, %v3293_v20  ;;  %v2341_v20 = vld [vmem:[%s3456_s12 + $0x78] sm:$0xff] }
 0xe03   : > { %2019 = vmatpush.msrb.mxu1 %v2341_v20 }
 0xe04   : > { %v1930_v11 = vsel %vm779_vm0, %v1925_v9, 0.0 }
 0xe05   : > { %1931 = vadd.xlane.f32.xlu0 %v1930_v11  ;;  %2020 = vmatpush.msrb.mxu1 %v2340_v19 }
 0xe07   : > { %2021 = vmatpush.msrb.mxu1 %v2339_v21 }
 0xe09   : > { %2022 = vmatpush.msrb.mxu1 %v2338_v24 }
 0xe0b   : > { %2023 = vmatpush.msrb.mxu1 %v2337_v26 }
 0xe0d   : > { %2024 = vmatpush.msrb.mxu1 %v2336_v36 }
 0xe0f   : > { %2025 = vmatpush.msrb.mxu1 %v2335_v40 }
 0xe11   : > { %2026 = vmatpush.msrb.mxu1 %v2334_v41 }
 0xe78   : > { %v1932_v12 = vpop.xlane.xlu0 %1931 }
 0xe79   : > { %v1933_v13 = vmul.f32 %v1932_v12, %v3210_v10 }
 0xe7b   : > { %v1934_v14 = vsub.f32 %v1925_v9, %v1933_v13 }
 0xe7d   : > { %v1935_v2 = vmul.f32 %v1934_v14, %v1934_v14 }
 0xe7f   : > { %v1936_v6 = vsel %vm779_vm0, %v1935_v2, 0.0 }
 0xe80   : > { %1937 = vadd.xlane.f32.xlu2 %v1936_v6 }
 0xef3   : > { %v1938_v22 = vpop.xlane.xlu2 %1937 }
 0xef4   : > { %v1939_v23 = vmul.f32 %v1938_v22, %v3210_v10 }
 0xef6   : > { %v1940_v25 = vadd.f32 1e-05, %v1939_v23  ;;  %v2479_v23 = vld [vmem:[%s3519_s24] ss:$0 sm:$0xff] }
 0xef8   : > { %2519 = vrsqrt.f32 %v1940_v25  ;;  %vm1947_vm15 = vweird.f32 %v1940_v25 }
 0xefe   : > { %v2520_v27 = vpop.eup %2519 }
 0xeff   : > { %v1942_v3 = vmul.f32 %v2520_v27, %v1940_v25  ;;  %vm1948_vm1 = vweird.f32 %v2520_v27  ;;  %v2480_v25 = vld [vmem:[%s3521_s3] ss:$0 sm:$0xff] }
 0xf00   : > { %vm1949_vm2 = vmor %vm1947_vm15, %vm1948_vm1 }
 0xf01   : > { %v1943_v28 = vmul.f32 %v2520_v27, %v1942_v3 }
 0xf03   : > { %v1944_v30 = vmul.f32 0.5, %v1943_v28 }
 0xf05   : > { %v1945_v31 = vsub.f32 1.5, %v1944_v30 }
 0xf07   : > { %v1946_v32 = vmul.f32 %v2520_v27, %v1945_v31 }
 0xf09   : > { %v1950_v34 = vsel %vm1949_vm2, %v2520_v27, %v1946_v32 }
 0xf0a   : > { %v1951_v35 = vmul.f32 %v1950_v34, %v1934_v14 }
 0xf0c   : > { %v1955_v38 = vmul.f32 %v2473_v33, %v1951_v35 }
 0xf0e   : > { %v1959_v39 = vadd.f32 %v2474_v37, %v1955_v38 }
 0xf10   : > { %2333 = vmatmul.msk.f32.vlgmr.msra.gmra.mxu0 %vm779_vm0, %v1959_v39 }
 0xf8d   : > { %v1990_v43 = vpop.f32.mrf.mxu0 }
 0xf8e   : > { %v1991_v44 = vadd.f32 %v2475_v42, %v1990_v43 }
 0xf90   : > { %v1993_v45 = vmax.f32 %v1991_v44, 0.0 }
 0xf92   : > { %2343 = vmatmul.msk.f32.vlgmr.msrb.gmra.mxu1 %vm1358_vm8, %v1993_v45 }
0x100f   : > { %v2028_v47 = vpop.f32.mrf.mxu1 }
0x1010   : > { %v2029_v48 = vadd.f32 %v2476_v46, %v2028_v47 }
0x1012   : > { %v2031_v49 = vadd.f32 %v2029_v48, %v1959_v39 }
0x1014   : > { %v2036_v50 = vsel %vm779_vm0, %v2031_v49, 0.0 }
0x1015   : > { %2037 = vadd.xlane.f32.xlu1 %v2036_v50 }
0x1088   : > { %v2038_v51 = vpop.xlane.xlu1 %2037 }
0x1089   : > { %v2039_v52 = vmul.f32 %v2038_v51, %v3210_v10 }
0x108b   : > { %v2040_v53 = vsub.f32 %v2031_v49, %v2039_v52 }
0x108d   : > { %v2041_v54 = vmul.f32 %v2040_v53, %v2040_v53 }
0x108f   : > { %v2042_v55 = vsel %vm779_vm0, %v2041_v54, 0.0 }
0x1090   : > { %2043 = vadd.xlane.f32.xlu0 %v2042_v55 }
0x1103   : > { %v2044_v56 = vpop.xlane.xlu0 %2043 }
0x1104   : > { %v2045_v57 = vmul.f32 %v2044_v56, %v3210_v10 }
0x1106   : > { %v2046_v29 = vadd.f32 1e-05, %v2045_v57 }
0x1108   : > { %2521 = vrsqrt.f32 %v2046_v29  ;;  %vm2053_vm3 = vweird.f32 %v2046_v29 }
0x110e   : > { %v2522_v58 = vpop.eup %2521 }
0x110f   : > { %v2048_v59 = vmul.f32 %v2522_v58, %v2046_v29  ;;  %vm2054_vm8 = vweird.f32 %v2522_v58 }
0x1110   : > { %vm2055_vm4 = vmor %vm2053_vm3, %vm2054_vm8 }
0x1111   : > { %v2049_v60 = vmul.f32 %v2522_v58, %v2048_v59 }
0x1113   : > { %v2050_v61 = vmul.f32 0.5, %v2049_v60 }
0x1115   : > { %v2051_v62 = vsub.f32 1.5, %v2050_v61 }
0x1117   : > { %v2052_v63 = vmul.f32 %v2522_v58, %v2051_v62 }
0x1119   : > { %v2056_v4 = vsel %vm2055_vm4, %v2522_v58, %v2052_v63 }
0x111a   : > { %v2057_v5 = vmul.f32 %v2056_v4, %v2040_v53 }
0x111c   : > { %v2061_v8 = vmul.f32 %v2477_v0, %v2057_v5 }
0x111e   : > { %v2065_v1 = vadd.f32 %v2478_v7, %v2061_v8 }
0x1120   : > { %v2068_v9 = vsel %vm779_vm0, %v2065_v1, 0.0 }
0x1121   : > { %2069 = vadd.xlane.f32.xlu2 %v2068_v9 }
0x1194   : > { %v2070_v11 = vpop.xlane.xlu2 %2069 }
0x1195   : > { %v2071_v12 = vmul.f32 %v2070_v11, %v3210_v10 }
0x1197   : > { %v2072_v13 = vsub.f32 %v2065_v1, %v2071_v12 }
0x1199   : > { %v2073_v14 = vmul.f32 %v2072_v13, %v2072_v13 }
0x119b   : > { %v2074_v2 = vsel %vm779_vm0, %v2073_v14, 0.0 }
0x119c   : > { %2075 = vadd.xlane.f32.xlu0 %v2074_v2 }
0x120f   : > { %v2076_v6 = vpop.xlane.xlu0 %2075 }
0x1210   : > { %v2077_v15 = vmul.f32 %v2076_v6, %v3210_v10 }
0x1212   : > { %v2078_v16 = vadd.f32 1e-05, %v2077_v15 }
0x1214   : > { %2523 = vrsqrt.f32 %v2078_v16  ;;  %vm2085_vm6 = vweird.f32 %v2078_v16 }
0x121a   : > { %v2524_v17 = vpop.eup %2523 }
0x121b   : > { %v2080_v18 = vmul.f32 %v2524_v17, %v2078_v16  ;;  %vm2086_vm5 = vweird.f32 %v2524_v17 }
0x121c   : > { %vm2087_vm7 = vmor %vm2085_vm6, %vm2086_vm5 }
0x121d   : > { %v2081_v20 = vmul.f32 %v2524_v17, %v2080_v18 }
0x121f   : > { %v2082_v19 = vmul.f32 0.5, %v2081_v20 }
0x1221   : > { %v2083_v21 = vsub.f32 1.5, %v2082_v19 }
0x1223   : > { %v2084_v22 = vmul.f32 %v2524_v17, %v2083_v21 }
0x1225   : > { %v2088_v10 = vsel %vm2087_vm7, %v2524_v17, %v2084_v22 }
0x1226   : > { %v2089_v24 = vmul.f32 %v2088_v10, %v2072_v13 }
0x1228   : > { %v2093_v26 = vmul.f32 %v2479_v23, %v2089_v24 }
0x122a   : > { %v2097_v27 = vadd.f32 %v2480_v25, %v2093_v26 }
0x122c   : > { %2098 = vst.msk [vmem:[%s767_s26] sm:$0xff] %vm779_vm0, %v2097_v27 }
0x122d   : > { %2762 = shalt.err (!%p2759_p10)
}
0x122e   : > { %2373 = dma.vmem_to_hbm [thread:$0]  (%p3027_p0), %s2113_s4, 128, %s2115_s1, %s2100_s29  }
0x122f PF: > { %s3522_s23 = sld [smem:[#allocation21_spill]] }
0x1230   : > { %s3524_s10 = sld [smem:[#allocation23_spill]] }
0x1235   : > { %s2126_s3 = sand.u32 1, %s3522_s23  }
0x1236   : > { %p3525_p12 = scmp.ge.s32.totalorder %s3524_s10, 2  ;;  %s2127_s26 = scalar_lea.sflag [#allocation4], %s2126_s3 }
0x1238   : > { %p2399_p5 = pnand %p3525_p12, %p3033_p6 }
0x123a   : > { %p2400_p11 = pneg %p2399_p5 }
0x123c   : > { %2800 = dma.done.wait (%p2400_p11), %s2127_s26, 128  }
0x123d   : > { %2802 = vsyncadd (%p2400_p11), %s2127_s26, 4294967168  ;;  %s3526_s24 = sld [smem:[#allocation24_spill]]  ;;  %s3529_s1 = smov %s2809_s22 }
0x123e   : > { %s3527_s16 = sld [smem:[#allocation22_spill]] }
0x123f   : > { %s3528_s23 = sld [smem:[#allocation25_spill]] }
0x1243   : > { %p38_p2 = scmp.ge.s32.totalorder %s3526_s24, 4  }
0x1244   : > { %s3530_s22 = smov %s3527_s16 }
0x1245   :  { %40 = sbr.rel (!%p38_p2) target bundleno = 25 (0x19), region = 194 }
0x124a   :  { %2133 = vsyncpa [#allocation3], 1 }
0x124b   :  { %2135 = vsyncpa [#allocation3 + $0x1], 1 }
0x124c   :  { %2136 = vsyncpa [#allocation6], 1 }
0x124d   :  { %2138 = vsyncpa [#allocation6 + $0x1], 1 }
0x124e   :  { %2139 = vsyncpa [#allocation9], 1 }
0x124f   :  { %2140 = vsyncpa [#allocation12], 1 }
0x1250   :  { %2141 = vsyncpa [#allocation4], 1 }
0x1251   :  { %2143 = vsyncpa [#allocation4 + $0x1], 1 }

</bundles_post_ra>
